<compile_context>
chip_gen: v7x
topology: tpu7x:2x2x1
jax: 0.10.0
libtpu: 0.0.40
codegen_flags: <defaults>
</compile_context>

<pallas_src>
import functools
import math

import jax
import jax.numpy as jnp
from jax.experimental import pallas as pl
from jax.experimental.pallas import tpu as pltpu


def textnn_kernel(x_ref, w1_ref, b1_ref, w2_ref, b2_ref, o_ref, *, approximate_gelu):
    # Cast the x tile to the compute dtype on the VPU (no-op for the f32 path).
    x = x_ref[...].astype(w1_ref.dtype)

    # ---- denseL1: (tm, D_in) @ (D_in, D_mid), f32 accumulation ----
    h = jnp.dot(x, w1_ref[...], preferred_element_type=jnp.float32)
    h = h + b1_ref[...]                          # b1 is (1, D_mid), broadcasts over rows

    # ---- gelu (f32) ----
    if approximate_gelu:
        # tanh-approx variant: routes to the EUP slot; slightly different numerics.
        h = jax.nn.gelu(h, approximate=True)
    else:
        inv_sqrt2 = 1.0 / math.sqrt(2.0)
        h = h * 0.5 * (1.0 + jax.lax.erf(h * inv_sqrt2))   # exact-erf gelu (reference)

    # ---- denseL2: (tm, D_mid) @ (D_mid, D_out), f32 accumulation ----
    o = jnp.dot(h.astype(w2_ref.dtype), w2_ref[...], preferred_element_type=jnp.float32)
    o = o + b2_ref[...]                          # b2 is (1, D_out)

    # dropout: eval-mode identity
    o_ref[...] = o.astype(o_ref.dtype)


def textnn_forward(x, w1_t, b1, w2_t, b2, *, tm=128, compute_dtype=jnp.bfloat16,
                   out_dtype=None, approximate_gelu=False):
    """x: (M, D_in); w1_t: (D_in, D_mid); b1: (1, D_mid); w2_t: (D_mid, D_out); b2: (1, D_out).

    Weights are stored pre-transposed (in_features, out_features) so the kernel
    computes x @ W + b directly on the MXU.  If the caller already keeps the weights
    in `compute_dtype`, the astype below is a no-op.
    """
    M, D_in = x.shape
    D_mid = w1_t.shape[1]
    D_out = w2_t.shape[1]
    if out_dtype is None:
        out_dtype = x.dtype

    # Weights to compute dtype (bf16 default); biases stay f32 for the epilogue.
    w1_c = w1_t.astype(compute_dtype)
    w2_c = w2_t.astype(compute_dtype)
    b1_f = b1.reshape(1, D_mid).astype(jnp.float32)
    b2_f = b2.reshape(1, D_out).astype(jnp.float32)

    # Row tile: if the batch fits in one tile, use the full batch as the block
    # (block dim == full array dim is always a legal layout); otherwise tile by tm
    # and let Pallas mask the ragged last block.
    tm_eff = M if M <= tm else tm
    grid = (pl.cdiv(M, tm_eff),)

    kernel = functools.partial(textnn_kernel, approximate_gelu=approximate_gelu)

    # VMEM footprint (resident weights + double-buffered x/out tiles) is ~2-3 MiB,
    # far below the default scoped limit on every generation incl. v7x (64 MiB).
    out = pl.pallas_call(
        kernel,
        out_shape=jax.ShapeDtypeStruct((M, D_out), out_dtype),
        grid=grid,
        in_specs=[
            pl.BlockSpec((tm_eff, D_in), lambda i: (i, 0)),    # x row tile (original dtype)
            pl.BlockSpec((D_in, D_mid), lambda i: (0, 0)),     # W1^T (resident)
            pl.BlockSpec((1, D_mid), lambda i: (0, 0)),        # b1 (resident)
            pl.BlockSpec((D_mid, D_out), lambda i: (0, 0)),    # W2^T (resident)
            pl.BlockSpec((1, D_out), lambda i: (0, 0)),        # b2 (resident)
        ],
        out_specs=pl.BlockSpec((tm_eff, D_out), lambda i: (i, 0)),
        compiler_params=pltpu.CompilerParams(
            dimension_semantics=("parallel",),
        ),
    )(x, w1_c, b1_f, w2_c, b2_f)

    return out


def reference_forward(x, w1_t, b1, w2_t, b2):
    h = x @ w1_t + b1
    h = h * 0.5 * (1.0 + jax.lax.erf(h / jnp.sqrt(2.0)))
    return h @ w2_t + b2


if __name__ == "__main__":
    # Module dims (TextNN defaults): input_dim=768, mindum_dim=512, out_dim=128.
    D_in, D_mid, D_out = 768, 512, 128
    batch = 20  # small batch; exercises the block-equals-full-batch path

    key = jax.random.PRNGKey(0)
    kx, kw1, kb1, kw2, kb2, kx2 = jax.random.split(key, 6)

    x = jax.random.normal(kx, (batch, D_in), dtype=jnp.float32)

    # Deterministic param init (PyTorch-Linear-style uniform bounds), pre-transposed.
    bound1 = 1.0 / math.sqrt(D_in)
    w1_t = jax.random.uniform(kw1, (D_in, D_mid), jnp.float32, -bound1, bound1)
    b1 = jax.random.uniform(kb1, (1, D_mid), jnp.float32, -bound1, bound1)

    bound2 = 1.0 / math.sqrt(D_mid)
    w2_t = jax.random.uniform(kw2, (D_mid, D_out), jnp.float32, -bound2, bound2)
    b2 = jax.random.uniform(kb2, (1, D_out), jnp.float32, -bound2, bound2)

    ref = reference_forward(x, w1_t, b1, w2_t, b2)

    # f32 compute path: tight check against the pure-JAX reference.
    out_f32 = textnn_forward(x, w1_t, b1, w2_t, b2, compute_dtype=jnp.float32)
    out_f32 = jax.block_until_ready(out_f32)
    assert out_f32.shape == (batch, D_out)
    assert jnp.allclose(out_f32, ref, atol=2e-3, rtol=2e-3), "f32 path mismatch vs reference"

    # bf16 compute path (default): looser tolerance (bf16 inputs/weights, f32 accumulate).
    out_bf16 = textnn_forward(x, w1_t, b1, w2_t, b2)  # compute_dtype=bf16 default
    out_bf16 = jax.block_until_ready(out_bf16)
    assert out_bf16.shape == (batch, D_out)
    assert jnp.allclose(out_bf16, ref, atol=5e-2, rtol=5e-2), "bf16 path mismatch vs reference"

    # Multi-block path with a ragged last row block (no wrapper pad / slice).
    batch2 = 200
    x2 = jax.random.normal(kx2, (batch2, D_in), dtype=jnp.float32)
    ref2 = reference_forward(x2, w1_t, b1, w2_t, b2)
    out2 = textnn_forward(x2, w1_t, b1, w2_t, b2, compute_dtype=jnp.float32, tm=128)
    out2 = jax.block_until_ready(out2)
    assert out2.shape == (batch2, D_out)
    assert jnp.allclose(out2, ref2, atol=2e-3, rtol=2e-3), "ragged-block path mismatch"

    print("KERNEL_OK")
</pallas_src>

<mosaic_0001>
module attributes {stable_mosaic.version = 11 : i64} {
  func.func @textnn_kernel(%arg0: i32, %arg1: memref<20x768xf32, #tpu.memory_space<vmem>>, %arg2: memref<768x512xf32, #tpu.memory_space<vmem>>, %arg3: memref<1x512xf32, #tpu.memory_space<vmem>>, %arg4: memref<512x128xf32, #tpu.memory_space<vmem>>, %arg5: memref<1x128xf32, #tpu.memory_space<vmem>>, %arg6: memref<20x128xf32, #tpu.memory_space<vmem>>) attributes {dimension_semantics = [#tpu.dimension_semantics<parallel>], iteration_bounds = array<i64: 1>, scalar_prefetch = 0 : i64, scratch_operands = 0 : i64, tpu.core_type = #tpu.core_type<tc>, window_params = [{transform_indices = @transform_0, window_bounds = array<i64: 20, 768>}, {pipeline_mode = #tpu.pipeline_mode<synchronous>, transform_indices = @transform_1, window_bounds = array<i64: 768, 512>}, {pipeline_mode = #tpu.pipeline_mode<synchronous>, transform_indices = @transform_2, window_bounds = array<i64: 1, 512>}, {pipeline_mode = #tpu.pipeline_mode<synchronous>, transform_indices = @transform_3, window_bounds = array<i64: 512, 128>}, {pipeline_mode = #tpu.pipeline_mode<synchronous>, transform_indices = @transform_4, window_bounds = array<i64: 1, 128>}, {transform_indices = @transform_5, window_bounds = array<i64: 20, 128>}]} {
    %c0 = arith.constant 0 : index
    %c0_0 = arith.constant 0 : index
    %0 = vector.load %arg1[%c0, %c0_0] : memref<20x768xf32, #tpu.memory_space<vmem>>, vector<20x768xf32>
    %c0_1 = arith.constant 0 : index
    %c0_2 = arith.constant 0 : index
    %1 = vector.load %arg2[%c0_1, %c0_2] : memref<768x512xf32, #tpu.memory_space<vmem>>, vector<768x512xf32>
    %cst = arith.constant dense<0.000000e+00> : vector<20x512xf32>
    %2 = tpu.matmul %0, %1, %cst {dimension_numbers = #tpu.dot_dimension_numbers<[1], [0], [0], [1], [0, 0, 1, 1], [], []>} : vector<20x768xf32>, vector<768x512xf32>, vector<20x512xf32> -> vector<20x512xf32>
    %c0_3 = arith.constant 0 : index
    %c0_4 = arith.constant 0 : index
    %3 = vector.load %arg3[%c0_3, %c0_4] : memref<1x512xf32, #tpu.memory_space<vmem>>, vector<1x512xf32>
    %4 = vector.broadcast %3 : vector<1x512xf32> to vector<20x512xf32>
    %5 = arith.addf %2, %4 : vector<20x512xf32>
    %cst_5 = arith.constant 5.000000e-01 : f32
    %6 = vector.broadcast %cst_5 : f32 to vector<20x512xf32>
    %7 = arith.mulf %5, %6 : vector<20x512xf32>
    %cst_6 = arith.constant 0.707106769 : f32
    %8 = vector.broadcast %cst_6 : f32 to vector<20x512xf32>
    %9 = arith.mulf %5, %8 : vector<20x512xf32>
    %10 = math.erf %9 : vector<20x512xf32>
    %cst_7 = arith.constant 1.000000e+00 : f32
    %11 = vector.broadcast %cst_7 : f32 to vector<20x512xf32>
    %12 = arith.addf %11, %10 : vector<20x512xf32>
    %13 = arith.mulf %7, %12 : vector<20x512xf32>
    %c0_8 = arith.constant 0 : index
    %c0_9 = arith.constant 0 : index
    %14 = vector.load %arg4[%c0_8, %c0_9] : memref<512x128xf32, #tpu.memory_space<vmem>>, vector<512x128xf32>
    %cst_10 = arith.constant dense<0.000000e+00> : vector<20x128xf32>
    %15 = tpu.matmul %13, %14, %cst_10 {dimension_numbers = #tpu.dot_dimension_numbers<[1], [0], [0], [1], [0, 0, 1, 1], [], []>} : vector<20x512xf32>, vector<512x128xf32>, vector<20x128xf32> -> vector<20x128xf32>
    %c0_11 = arith.constant 0 : index
    %c0_12 = arith.constant 0 : index
    %16 = vector.load %arg5[%c0_11, %c0_12] : memref<1x128xf32, #tpu.memory_space<vmem>>, vector<1x128xf32>
    %17 = vector.broadcast %16 : vector<1x128xf32> to vector<20x128xf32>
    %18 = arith.addf %15, %17 : vector<20x128xf32>
    %c0_13 = arith.constant 0 : index
    %c0_14 = arith.constant 0 : index
    %19 = vector.load %arg6[%c0_13, %c0_14] : memref<20x128xf32, #tpu.memory_space<vmem>>, vector<20x128xf32>
    tpu.vector_store %arg6[%c0_13, %c0_14], %18 {strides = array<i32>} : memref<20x128xf32, #tpu.memory_space<vmem>>, vector<20x128xf32>,
    return
  }
  func.func @transform_0(%arg0: i32) -> (i32, i32) {
    %c0_i32 = arith.constant 0 : i32
    %c0_i32_0 = arith.constant 0 : i32
    return %arg0, %c0_i32 : i32, i32
  }
  func.func @transform_1(%arg0: i32) -> (i32, i32) {
    %c0_i32 = arith.constant 0 : i32
    %c0_i32_0 = arith.constant 0 : i32
    %c0_i32_1 = arith.constant 0 : i32
    return %c0_i32, %c0_i32_0 : i32, i32
  }
  func.func @transform_2(%arg0: i32) -> (i32, i32) {
    %c0_i32 = arith.constant 0 : i32
    %c0_i32_0 = arith.constant 0 : i32
    %c0_i32_1 = arith.constant 0 : i32
    return %c0_i32, %c0_i32_0 : i32, i32
  }
  func.func @transform_3(%arg0: i32) -> (i32, i32) {
    %c0_i32 = arith.constant 0 : i32
    %c0_i32_0 = arith.constant 0 : i32
    %c0_i32_1 = arith.constant 0 : i32
    return %c0_i32, %c0_i32_0 : i32, i32
  }
  func.func @transform_4(%arg0: i32) -> (i32, i32) {
    %c0_i32 = arith.constant 0 : i32
    %c0_i32_0 = arith.constant 0 : i32
    %c0_i32_1 = arith.constant 0 : i32
    return %c0_i32, %c0_i32_0 : i32, i32
  }
  func.func @transform_5(%arg0: i32) -> (i32, i32) {
    %c0_i32 = arith.constant 0 : i32
    %c0_i32_0 = arith.constant 0 : i32
    return %arg0, %c0_i32 : i32, i32
  }
}

</mosaic_0001>

<bundles_post_ra>
// kernel: tpu_custom_call.1
= control target key start
LH: loop header
LB: loop body
LE: loop exit
PB: predicated region body
PF: predicated region fallthrough
CT: control target
= control target key end

     0   :  { %10 = vsyncpa [#allocation3], 0  ;;  %s2195_s0 = inlined_call_operand.hbm [shape: f32[20,768], index: 0, kind: input, shape index: {}]   ;;  %s2196_s1 = inlined_call_operand.hbm [shape: f32[768,512], index: 1, kind: input, shape index: {}]   ;;  %s2197_s2 = inlined_call_operand.hbm [shape: f32[1,512], index: 2, kind: input, shape index: {}]   ;;  %s2198_s3 = inlined_call_operand.hbm [shape: f32[512,128], index: 3, kind: input, shape index: {}]   ;;  %s2199_s4 = inlined_call_operand.hbm [shape: f32[1,128], index: 4, kind: input, shape index: {}]   ;;  %s2200_s5 = inlined_call_operand.hbm [shape: f32[20,128], index: 5, kind: output, shape index: {}]  }
   0x1   :  { %11 = vsyncpa [#allocation6], 0 }
   0x2   :  { %12 = vsyncpa [#allocation9], 0 }
   0x3   :  { %13 = vsyncpa [#allocation4], 0  ;;  %s2063_s18 = smov [#allocation5]   ;;  %s1923_s22 = scalar_lea.hbm %s2196_s1, 49152 }
   0x4   :  { %s31_s19 = sshll.u32 %s2063_s18, 4  ;;  %p1924_p0 = scmp.ne.s32.totalorder %s2196_s1, %s1923_s22  ;;  %s32_s19 = int_to_ptr.vmem [resolvable:$true] %s31_s19 }
   0x5   :  { %p1927_p1 = scmp.lt.u32.totalorder %s1923_s22, %s2196_s1 }
   0x7   :  { %p1929_p2 = pnand %p1927_p1, %p1924_p0 }
   0x9   :  { %1932 = shalt.err (!%p1929_p2)
}
   0xa   :  { %s1933_s27 = scalar_lea.vmem %s32_s19, 49152  ;;  %p1938_p4 = scmp.lt.s32.totalorder %s32_s19, %s32_s19 }
   0xb   :  { %p1934_p3 = scmp.ne.s32.totalorder %s32_s19, %s1933_s27  ;;  %p1939_p5 = scmp.lt.s32.totalorder %s1933_s27, %s1933_s27 }
   0xd   :  { %p1940_p6 = por %p1939_p5, %p1938_p4 }
   0xf   :  { %p1941_p7 = pnand %p1940_p6, %p1934_p3 }
  0x11   :  { %1944 = shalt.err (!%p1941_p7)
}
  0x12   :  { %s2064_s28 = smov 512   ;;  %s2065_s29 = smov 32  }
  0x13   :  { %37 = dma.hbm_to_vmem [thread:$0]  %s2196_s1, 49152, %s32_s19, [#allocation6], %s2064_s28, %s2064_s28, %s2065_s29  }
  0x14   :  { %s2066_s7 = smov [#allocation8]   ;;  %s1945_s11 = scalar_lea.hbm %s2198_s3, 8192 }
  0x15   :  { %s53_s8 = sshll.u32 %s2066_s7, 4  ;;  %p1946_p8 = scmp.ne.s32.totalorder %s2198_s3, %s1945_s11  ;;  %s54_s8 = int_to_ptr.vmem [resolvable:$true] %s53_s8 }
  0x16   :  { %p1949_p9 = scmp.lt.u32.totalorder %s1945_s11, %s2198_s3 }
  0x18   :  { %p1951_p10 = pnand %p1949_p9, %p1946_p8 }
  0x1a   :  { %1954 = shalt.err (!%p1951_p10)
}
  0x1b   :  { %s1955_s16 = scalar_lea.vmem %s54_s8, 8192  ;;  %p1960_p12 = scmp.lt.s32.totalorder %s54_s8, %s54_s8 }
  0x1c   :  { %p1956_p11 = scmp.ne.s32.totalorder %s54_s8, %s1955_s16  ;;  %p1961_p13 = scmp.lt.s32.totalorder %s1955_s16, %s1955_s16 }
  0x1e   :  { %p1962_p0 = por %p1961_p13, %p1960_p12 }
  0x20   :  { %p1963_p1 = pnand %p1962_p0, %p1956_p11 }
  0x22   :  { %1966 = shalt.err (!%p1963_p1)
}
  0x23   :  { %s2067_s1 = smov 128   ;;  %s2068_s17 = smov 8  }
  0x24   :  { %59 = dma.hbm_to_vmem [thread:$0]  %s2198_s3, 8192, %s54_s8, [#allocation9], %s2067_s1, %s2067_s1, %s2068_s17  }
  0x25   :  { %s2069_s20 = smov [#allocation2]   ;;  %s1967_s24 = scalar_lea.hbm %s2195_s0, 2304 }
  0x26   :  { %s19_s21 = sshll.u32 %s2069_s20, 4  ;;  %p1968_p2 = scmp.ne.s32.totalorder %s2195_s0, %s1967_s24  ;;  %s20_s21 = int_to_ptr.vmem [resolvable:$true] %s19_s21 }
  0x27   :  { %p1971_p3 = scmp.lt.u32.totalorder %s1967_s24, %s2195_s0 }
  0x29   :  { %p1973_p4 = pnand %p1971_p3, %p1968_p2 }
  0x2b   :  { %1976 = shalt.err (!%p1973_p4)
}
  0x2c   :  { %s1977_s29 = scalar_lea.vmem %s20_s21, 2304  ;;  %p1982_p6 = scmp.lt.s32.totalorder %s20_s21, %s20_s21 }
  0x2d   :  { %p1978_p5 = scmp.ne.s32.totalorder %s20_s21, %s1977_s29  ;;  %p1983_p7 = scmp.lt.s32.totalorder %s1977_s29, %s1977_s29 }
  0x2f   :  { %p1984_p8 = por %p1983_p7, %p1982_p6 }
  0x31   :  { %p1985_p9 = pnand %p1984_p8, %p1978_p5 }
  0x33   :  { %1988 = shalt.err (!%p1985_p9)
}
  0x34   :  { %s2070_s3 = smov 768   ;;  %s2071_s30 = smov 48  }
  0x35   :  { %25 = dma.hbm_to_vmem [thread:$0]  %s2195_s0, 2304, %s20_s21, [#allocation3], %s2070_s3, %s2070_s3, %s2071_s30  }
  0x36   :  { %s2072_s8 = smov [#allocation7]   ;;  %s2073_s10 = smov [#allocation10]  }
  0x37   :  { %s44_s9 = sshll.u32 %s2072_s8, 4  ;;  %s66_s11 = sshll.u32 %s2073_s10, 4  ;;  %s45_s9 = int_to_ptr.vmem [resolvable:$true] %s44_s9  ;;  %s67_s11 = int_to_ptr.vmem [resolvable:$true] %s66_s11 }
  0x38   :  { %s1989_s14 = scalar_lea.hbm %s2197_s2, 64 }
  0x39   :  { %p1990_p10 = scmp.ne.s32.totalorder %s2197_s2, %s1989_s14  ;;  %p1993_p11 = scmp.lt.u32.totalorder %s1989_s14, %s2197_s2 }
  0x3b   :  { %p1995_p12 = pnand %p1993_p11, %p1990_p10 }
  0x3d   :  { %1998 = shalt.err (!%p1995_p12)
}
  0x3e   :  { %s1999_s0 = scalar_lea.vmem %s45_s9, 64  ;;  %p2004_p0 = scmp.lt.s32.totalorder %s45_s9, %s45_s9 }
  0x3f   :  { %p2000_p13 = scmp.ne.s32.totalorder %s45_s9, %s1999_s0  ;;  %p2005_p1 = scmp.lt.s32.totalorder %s1999_s0, %s1999_s0 }
  0x41   :  { %p2006_p2 = por %p2005_p1, %p2004_p0 }
  0x43   :  { %p2007_p3 = pnand %p2006_p2, %p2000_p13 }
  0x45   :  { %2010 = shalt.err (!%p2007_p3)
}
  0x46   :  { %47 = dma.hbm_to_vmem [thread:$0]  %s2197_s2, 64, %s45_s9, [#allocation6]  }
  0x47   :  { %s2011_s24 = scalar_lea.hbm %s2199_s4, 16 }
  0x48   :  { %p2012_p4 = scmp.ne.s32.totalorder %s2199_s4, %s2011_s24  ;;  %p2015_p5 = scmp.lt.u32.totalorder %s2011_s24, %s2199_s4 }
  0x4a   :  { %p2017_p6 = pnand %p2015_p5, %p2012_p4 }
  0x4c   :  { %2020 = shalt.err (!%p2017_p6)
}
  0x4d   :  { %s2021_s29 = scalar_lea.vmem %s67_s11, 16  ;;  %s2025_s3 = scalar_lea.vmem %s67_s11, 32 }
  0x4e   :  { %p2022_p7 = scmp.ne.s32.totalorder %s67_s11, %s2021_s29  ;;  %p2026_p8 = scmp.lt.s32.totalorder %s67_s11, %s67_s11 }
  0x4f   :  { %p2027_p9 = scmp.lt.s32.totalorder %s2025_s3, %s2021_s29 }
  0x51   :  { %p2028_p10 = por %p2027_p9, %p2026_p8 }
  0x53   :  { %p2029_p11 = pnand %p2028_p10, %p2022_p7 }
  0x55   :  { %2032 = shalt.err (!%p2029_p11)
}
  0x56   :  { %69 = dma.hbm_to_vmem [thread:$0]  %s2199_s4, 16, %s67_s11, [#allocation9]  }
  0x57   :  { %2055 = dma.done.wait [#allocation3], 2304  }
  0x58   :  { %2056 = vsyncadd [#allocation3], 4294964992 }
  0x59   :  { %2057 = dma.done.wait [#allocation6], 49216  }
  0x5a   :  { %2058 = vsyncadd [#allocation6], 4294918080 }
  0x5b   :  { %2059 = dma.done.wait [#allocation9], 8208  }
  0x5c   :  { %2060 = vsyncadd [#allocation9], 4294959088  ;;  %v104_v0 = vld [vmem:[#allocation5 + $0x8] sm:$0xff]  ;;  %v106_v2 = vld [vmem:[#allocation5 + $0x18] sm:$0xff]  ;;  %s2074_s4 = smov [#allocation11]  }
  0x5d   :  { %v108_v1 = vld [vmem:[#allocation5 + $0x28] sm:$0xff]  ;;  %v110_v4 = vld [vmem:[#allocation5 + $0x38] sm:$0xff]  ;;  %v103_v5 = vld [vmem:[#allocation5] sm:$0xff]  ;;  %s1306_s6 = sshll.u32 %s2074_s4, 4  ;;  %s1307_s6 = int_to_ptr.vmem [resolvable:$true] %s1306_s6 }
  0x5e   :  { %v1403_v3 = vpack.c.bf16 %v108_v1, %v104_v0  ;;  %v107_v6 = vld [vmem:[#allocation5 + $0x20] sm:$0xff]  ;;  %v1595_v7 = vpack.c.bf16 %v110_v4, %v106_v2  ;;  %v105_v9 = vld [vmem:[#allocation5 + $0x10] sm:$0xff]  ;;  %v112_v11 = vld [vmem:[#allocation5 + $0x48] sm:$0xff]  ;;  %s2033_s7 = scalar_lea.vmem %s1307_s6, 384  ;;  %p2038_p13 = scmp.lt.s32.totalorder %s1307_s6, %s1307_s6 }
  0x5f   :  { %v1405_v8 = vpack.c.bf16 %v107_v6, %v103_v5  ;;  %v109_v10 = vld [vmem:[#allocation5 + $0x30] sm:$0xff]  ;;  %v116_v13 = vld [vmem:[#allocation5 + $0x68] sm:$0xff]  ;;  %v114_v14 = vld [vmem:[#allocation5 + $0x58] sm:$0xff]  ;;  %p2034_p12 = scmp.ne.s32.totalorder %s1307_s6, %s2033_s7  ;;  %p2039_p0 = scmp.lt.s32.totalorder %s2033_s7, %s2033_s7 }
  0x60   :  { %1404 = vmatprep.subr.bf16.mxu0 %v1403_v3  ;;  %v1597_v12 = vpack.c.bf16 %v109_v10, %v105_v9  ;;  %v118_v15 = vld [vmem:[#allocation5 + $0x78] sm:$0xff]  ;;  %1596 = vmatprep.subr.bf16.mxu1 %v1595_v7  ;;  %v1407_v16 = vpack.c.bf16 %v116_v13, %v112_v11  ;;  %v111_v18 = vld [vmem:[#allocation5 + $0x40] sm:$0xff]  ;;  %v113_v20 = vld [vmem:[#allocation5 + $0x50] sm:$0xff] }
  0x61   :  { %1406 = vmatpush1.bf16.msra.mxu0 %v1405_v8  ;;  %v1599_v17 = vpack.c.bf16 %v118_v15, %v114_v14  ;;  %v115_v19 = vld [vmem:[#allocation5 + $0x60] sm:$0xff]  ;;  %v117_v22 = vld [vmem:[#allocation5 + $0x70] sm:$0xff]  ;;  %v120_v23 = vld [vmem:[#allocation5 + $0x88] sm:$0xff]  ;;  %p2040_p1 = por %p2039_p0, %p2038_p13 }
  0x62   :  { %1598 = vmatpush1.bf16.msra.mxu1 %v1597_v12  ;;  %v1409_v21 = vpack.c.bf16 %v115_v19, %v111_v18  ;;  %v124_v24 = vld [vmem:[#allocation5 + $0xa8] sm:$0xff]  ;;  %1408 = vmatprep.subr.bf16.mxu0 %v1407_v16  ;;  %v1601_v25 = vpack.c.bf16 %v117_v22, %v113_v20  ;;  %v122_v27 = vld [vmem:[#allocation5 + $0x98] sm:$0xff]  ;;  %v119_v29 = vld [vmem:[#allocation5 + $0x80] sm:$0xff] }
  0x63   :  { %1600 = vmatprep.subr.bf16.mxu1 %v1599_v17  ;;  %v1411_v26 = vpack.c.bf16 %v124_v24, %v120_v23  ;;  %v126_v28 = vld [vmem:[#allocation5 + $0xb8] sm:$0xff]  ;;  %v123_v31 = vld [vmem:[#allocation5 + $0xa0] sm:$0xff]  ;;  %v121_v32 = vld [vmem:[#allocation5 + $0x90] sm:$0xff]  ;;  %p2041_p2 = pnand %p2040_p1, %p2034_p12 }
  0x64   :  { %v1603_v30 = vpack.c.bf16 %v126_v28, %v122_v27  ;;  %v125_v33 = vld [vmem:[#allocation5 + $0xb0] sm:$0xff]  ;;  %v1413_v34 = vpack.c.bf16 %v123_v31, %v119_v29  ;;  %v128_v35 = vld [vmem:[#allocation5 + $0xc8] sm:$0xff]  ;;  %v130_v37 = vld [vmem:[#allocation5 + $0xd8] sm:$0xff] }
  0x65   :  { %1410 = vmatpush1.bf16.msra.mxu0 %v1409_v21  ;;  %v132_v36 = vld [vmem:[#allocation5 + $0xe8] sm:$0xff]  ;;  %v1605_v38 = vpack.c.bf16 %v125_v33, %v121_v32  ;;  %v134_v40 = vld [vmem:[#allocation5 + $0xf8] sm:$0xff]  ;;  %v127_v41 = vld [vmem:[#allocation5 + $0xc0] sm:$0xff] }
  0x66   :  { %1602 = vmatpush1.bf16.msra.mxu1 %v1601_v25  ;;  %1412 = vmatprep.subr.bf16.mxu0 %v1411_v26  ;;  %v1415_v39 = vpack.c.bf16 %v132_v36, %v128_v35  ;;  %v131_v42 = vld [vmem:[#allocation5 + $0xe0] sm:$0xff]  ;;  %v1607_v43 = vpack.c.bf16 %v134_v40, %v130_v37  ;;  %v129_v44 = vld [vmem:[#allocation5 + $0xd0] sm:$0xff]  ;;  %v136_v46 = vld [vmem:[#allocation5 + $0x108] sm:$0xff] }
  0x67   :  { %1604 = vmatprep.subr.bf16.mxu1 %v1603_v30  ;;  %v133_v45 = vld [vmem:[#allocation5 + $0xf0] sm:$0xff]  ;;  %v140_v47 = vld [vmem:[#allocation5 + $0x128] sm:$0xff]  ;;  %v138_v48 = vld [vmem:[#allocation5 + $0x118] sm:$0xff]  ;;  %v1417_v50 = vpack.c.bf16 %v131_v42, %v127_v41 }
  0x68   :  { %v142_v49 = vld [vmem:[#allocation5 + $0x138] sm:$0xff]  ;;  %v1609_v51 = vpack.c.bf16 %v133_v45, %v129_v44  ;;  %v1419_v52 = vpack.c.bf16 %v140_v47, %v136_v46  ;;  %v135_v53 = vld [vmem:[#allocation5 + $0x100] sm:$0xff]  ;;  %v137_v55 = vld [vmem:[#allocation5 + $0x110] sm:$0xff] }
  0x69   :  { %1414 = vmatpush1.bf16.msra.mxu0 %v1413_v34  ;;  %v139_v54 = vld [vmem:[#allocation5 + $0x120] sm:$0xff]  ;;  %v1611_v56 = vpack.c.bf16 %v142_v49, %v138_v48  ;;  %v141_v57 = vld [vmem:[#allocation5 + $0x130] sm:$0xff]  ;;  %v144_v58 = vld [vmem:[#allocation5 + $0x148] sm:$0xff] }
  0x6a   :  { %1606 = vmatpush1.bf16.msra.mxu1 %v1605_v38  ;;  %1416 = vmatprep.subr.bf16.mxu0 %v1415_v39  ;;  %v148_v59 = vld [vmem:[#allocation5 + $0x168] sm:$0xff]  ;;  %v146_v60 = vld [vmem:[#allocation5 + $0x158] sm:$0xff]  ;;  %v1421_v62 = vpack.c.bf16 %v139_v54, %v135_v53  ;;  %v1613_v63 = vpack.c.bf16 %v141_v57, %v137_v55  ;;  %v143_v1 = vld [vmem:[#allocation5 + $0x140] sm:$0xff] }
  0x6b   :  { %1608 = vmatprep.subr.bf16.mxu1 %v1607_v43  ;;  %v150_v61 = vld [vmem:[#allocation5 + $0x178] sm:$0xff]  ;;  %v1423_v0 = vpack.c.bf16 %v148_v59, %v144_v58  ;;  %v147_v2 = vld [vmem:[#allocation5 + $0x160] sm:$0xff]  ;;  %v145_v3 = vld [vmem:[#allocation5 + $0x150] sm:$0xff] }
  0x6c   :  { %v1615_v4 = vpack.c.bf16 %v150_v61, %v146_v60  ;;  %v149_v5 = vld [vmem:[#allocation5 + $0x170] sm:$0xff]  ;;  %v152_v6 = vld [vmem:[#allocation5 + $0x188] sm:$0xff]  ;;  %v154_v8 = vld [vmem:[#allocation5 + $0x198] sm:$0xff]  ;;  %v1425_v10 = vpack.c.bf16 %v147_v2, %v143_v1 }
  0x6d   :  { %1418 = vmatpush1.bf16.msra.mxu0 %v1417_v50  ;;  %v156_v7 = vld [vmem:[#allocation5 + $0x1a8] sm:$0xff]  ;;  %v158_v9 = vld [vmem:[#allocation5 + $0x1b8] sm:$0xff]  ;;  %v1617_v11 = vpack.c.bf16 %v149_v5, %v145_v3  ;;  %v151_v13 = vld [vmem:[#allocation5 + $0x180] sm:$0xff] }
  0x6e   :  { %1610 = vmatpush1.bf16.msra.mxu1 %v1609_v51  ;;  %1420 = vmatprep.subr.bf16.mxu0 %v1419_v52  ;;  %v1427_v12 = vpack.c.bf16 %v156_v7, %v152_v6  ;;  %v155_v14 = vld [vmem:[#allocation5 + $0x1a0] sm:$0xff]  ;;  %v153_v15 = vld [vmem:[#allocation5 + $0x190] sm:$0xff]  ;;  %v1619_v16 = vpack.c.bf16 %v158_v9, %v154_v8  ;;  %v160_v18 = vld [vmem:[#allocation5 + $0x1c8] sm:$0xff] }
  0x6f   :  { %1612 = vmatprep.subr.bf16.mxu1 %v1611_v56  ;;  %v157_v17 = vld [vmem:[#allocation5 + $0x1b0] sm:$0xff]  ;;  %v164_v19 = vld [vmem:[#allocation5 + $0x1e8] sm:$0xff]  ;;  %v162_v20 = vld [vmem:[#allocation5 + $0x1d8] sm:$0xff]  ;;  %v1429_v22 = vpack.c.bf16 %v155_v14, %v151_v13 }
  0x70   :  { %v166_v21 = vld [vmem:[#allocation5 + $0x1f8] sm:$0xff]  ;;  %v1621_v23 = vpack.c.bf16 %v157_v17, %v153_v15  ;;  %v1431_v24 = vpack.c.bf16 %v164_v19, %v160_v18  ;;  %v159_v25 = vld [vmem:[#allocation5 + $0x1c0] sm:$0xff]  ;;  %v161_v27 = vld [vmem:[#allocation5 + $0x1d0] sm:$0xff] }
  0x71   :  { %1422 = vmatpush1.bf16.msra.mxu0 %v1421_v62  ;;  %v163_v26 = vld [vmem:[#allocation5 + $0x1e0] sm:$0xff]  ;;  %v1623_v28 = vpack.c.bf16 %v166_v21, %v162_v20  ;;  %v165_v29 = vld [vmem:[#allocation5 + $0x1f0] sm:$0xff]  ;;  %v168_v30 = vld [vmem:[#allocation5 + $0x208] sm:$0xff] }
  0x72   :  { %1614 = vmatpush1.bf16.msra.mxu1 %v1613_v63  ;;  %1424 = vmatprep.subr.bf16.mxu0 %v1423_v0  ;;  %v172_v31 = vld [vmem:[#allocation5 + $0x228] sm:$0xff]  ;;  %v170_v32 = vld [vmem:[#allocation5 + $0x218] sm:$0xff]  ;;  %v1433_v34 = vpack.c.bf16 %v163_v26, %v159_v25  ;;  %v1625_v35 = vpack.c.bf16 %v165_v29, %v161_v27  ;;  %v167_v37 = vld [vmem:[#allocation5 + $0x200] sm:$0xff] }
  0x73   :  { %1616 = vmatprep.subr.bf16.mxu1 %v1615_v4  ;;  %v174_v33 = vld [vmem:[#allocation5 + $0x238] sm:$0xff]  ;;  %v1435_v36 = vpack.c.bf16 %v172_v31, %v168_v30  ;;  %v171_v38 = vld [vmem:[#allocation5 + $0x220] sm:$0xff]  ;;  %v169_v39 = vld [vmem:[#allocation5 + $0x210] sm:$0xff] }
  0x74   :  { %v1627_v40 = vpack.c.bf16 %v174_v33, %v170_v32  ;;  %v173_v41 = vld [vmem:[#allocation5 + $0x230] sm:$0xff]  ;;  %v176_v42 = vld [vmem:[#allocation5 + $0x248] sm:$0xff]  ;;  %v178_v44 = vld [vmem:[#allocation5 + $0x258] sm:$0xff]  ;;  %v1437_v46 = vpack.c.bf16 %v171_v38, %v167_v37 }
  0x75   :  { %1426 = vmatpush1.bf16.msra.mxu0 %v1425_v10  ;;  %v180_v43 = vld [vmem:[#allocation5 + $0x268] sm:$0xff]  ;;  %v182_v45 = vld [vmem:[#allocation5 + $0x278] sm:$0xff]  ;;  %v1629_v47 = vpack.c.bf16 %v173_v41, %v169_v39  ;;  %v175_v49 = vld [vmem:[#allocation5 + $0x240] sm:$0xff] }
  0x76   :  { %1618 = vmatpush1.bf16.msra.mxu1 %v1617_v11  ;;  %1428 = vmatprep.subr.bf16.mxu0 %v1427_v12  ;;  %v1439_v48 = vpack.c.bf16 %v180_v43, %v176_v42  ;;  %v179_v50 = vld [vmem:[#allocation5 + $0x260] sm:$0xff]  ;;  %v177_v51 = vld [vmem:[#allocation5 + $0x250] sm:$0xff]  ;;  %v1631_v52 = vpack.c.bf16 %v182_v45, %v178_v44  ;;  %v184_v54 = vld [vmem:[#allocation5 + $0x288] sm:$0xff] }
  0x77   :  { %1620 = vmatprep.subr.bf16.mxu1 %v1619_v16  ;;  %v181_v53 = vld [vmem:[#allocation5 + $0x270] sm:$0xff]  ;;  %v188_v55 = vld [vmem:[#allocation5 + $0x2a8] sm:$0xff]  ;;  %v186_v56 = vld [vmem:[#allocation5 + $0x298] sm:$0xff]  ;;  %v1441_v58 = vpack.c.bf16 %v179_v50, %v175_v49 }
  0x78   :  { %v190_v57 = vld [vmem:[#allocation5 + $0x2b8] sm:$0xff]  ;;  %v1633_v59 = vpack.c.bf16 %v181_v53, %v177_v51  ;;  %v1443_v60 = vpack.c.bf16 %v188_v55, %v184_v54  ;;  %v183_v61 = vld [vmem:[#allocation5 + $0x280] sm:$0xff]  ;;  %v185_v63 = vld [vmem:[#allocation5 + $0x290] sm:$0xff] }
  0x79   :  { %1430 = vmatpush1.bf16.msra.mxu0 %v1429_v22  ;;  %v187_v62 = vld [vmem:[#allocation5 + $0x2a0] sm:$0xff]  ;;  %v1635_v0 = vpack.c.bf16 %v190_v57, %v186_v56  ;;  %v189_v1 = vld [vmem:[#allocation5 + $0x2b0] sm:$0xff]  ;;  %v192_v2 = vld [vmem:[#allocation5 + $0x2c8] sm:$0xff] }
  0x7a   :  { %1622 = vmatpush1.bf16.msra.mxu1 %v1621_v23  ;;  %1432 = vmatprep.subr.bf16.mxu0 %v1431_v24  ;;  %v196_v3 = vld [vmem:[#allocation5 + $0x2e8] sm:$0xff]  ;;  %v194_v4 = vld [vmem:[#allocation5 + $0x2d8] sm:$0xff]  ;;  %v1445_v6 = vpack.c.bf16 %v187_v62, %v183_v61  ;;  %v191_v7 = vld [vmem:[#allocation5 + $0x2c0] sm:$0xff]  ;;  %v1637_v8 = vpack.c.bf16 %v189_v1, %v185_v63 }
  0x7b   :  { %1624 = vmatprep.subr.bf16.mxu1 %v1623_v28  ;;  %v198_v5 = vld [vmem:[#allocation5 + $0x2f8] sm:$0xff]  ;;  %v1447_v9 = vpack.c.bf16 %v196_v3, %v192_v2  ;;  %v195_v10 = vld [vmem:[#allocation5 + $0x2e0] sm:$0xff]  ;;  %v193_v11 = vld [vmem:[#allocation5 + $0x2d0] sm:$0xff] }
  0x7c   :  { %v197_v12 = vld [vmem:[#allocation5 + $0x2f0] sm:$0xff]  ;;  %v1639_v13 = vpack.c.bf16 %v198_v5, %v194_v4  ;;  %v200_v14 = vld [vmem:[#allocation5 + $0x308] sm:$0xff]  ;;  %v86_v16 = vld [vmem:[#allocation2 + $0x8] sm:$0xff]  ;;  %v1449_v19 = vpack.c.bf16 %v195_v10, %v191_v7 }
  0x7d   :  { %1434 = vmatpush1.bf16.msra.mxu0 %v1433_v34  ;;  %v204_v15 = vld [vmem:[#allocation5 + $0x328] sm:$0xff]  ;;  %v202_v17 = vld [vmem:[#allocation5 + $0x318] sm:$0xff]  ;;  %573 = vmatprep.mubr.f32.mxu0 %v86_v16  ;;  %v1641_v20 = vpack.c.bf16 %v197_v12, %v193_v11  ;;  %v199_v22 = vld [vmem:[#allocation5 + $0x300] sm:$0xff] }
  0x7e   :  { %1626 = vmatpush1.bf16.msra.mxu1 %v1625_v35  ;;  %1436 = vmatprep.subr.bf16.mxu0 %v1435_v36  ;;  %v206_v18 = vld [vmem:[#allocation5 + $0x338] sm:$0xff]  ;;  %v1451_v21 = vpack.c.bf16 %v204_v15, %v200_v14  ;;  %v203_v23 = vld [vmem:[#allocation5 + $0x320] sm:$0xff]  ;;  %v201_v24 = vld [vmem:[#allocation5 + $0x310] sm:$0xff] }
  0x7f   :  { %1628 = vmatprep.subr.bf16.mxu1 %v1627_v40  ;;  %822 = vmatprep.mubr.f32.mxu1 %v86_v16  ;;  %v1643_v25 = vpack.c.bf16 %v206_v18, %v202_v17  ;;  %v205_v26 = vld [vmem:[#allocation5 + $0x330] sm:$0xff]  ;;  %v208_v27 = vld [vmem:[#allocation5 + $0x348] sm:$0xff]  ;;  %v210_v29 = vld [vmem:[#allocation5 + $0x358] sm:$0xff]  ;;  %v1453_v31 = vpack.c.bf16 %v203_v23, %v199_v22 }
  0x80   :  { %v212_v28 = vld [vmem:[#allocation5 + $0x368] sm:$0xff]  ;;  %v214_v30 = vld [vmem:[#allocation5 + $0x378] sm:$0xff]  ;;  %v1645_v32 = vpack.c.bf16 %v205_v26, %v201_v24  ;;  %v207_v34 = vld [vmem:[#allocation5 + $0x340] sm:$0xff] }
  0x81   :  { %1438 = vmatpush1.bf16.msra.mxu0 %v1437_v46  ;;  %v1455_v33 = vpack.c.bf16 %v212_v28, %v208_v27  ;;  %v211_v35 = vld [vmem:[#allocation5 + $0x360] sm:$0xff]  ;;  %v209_v36 = vld [vmem:[#allocation5 + $0x350] sm:$0xff]  ;;  %v1647_v37 = vpack.c.bf16 %v214_v30, %v210_v29  ;;  %v216_v39 = vld [vmem:[#allocation5 + $0x388] sm:$0xff] }
  0x82   :  { %1630 = vmatpush1.bf16.msra.mxu1 %v1629_v47  ;;  %1440 = vmatprep.subr.bf16.mxu0 %v1439_v48  ;;  %v213_v38 = vld [vmem:[#allocation5 + $0x370] sm:$0xff]  ;;  %v220_v40 = vld [vmem:[#allocation5 + $0x3a8] sm:$0xff]  ;;  %v218_v41 = vld [vmem:[#allocation5 + $0x398] sm:$0xff]  ;;  %v1457_v43 = vpack.c.bf16 %v211_v35, %v207_v34 }
  0x83   :  { %1632 = vmatprep.subr.bf16.mxu1 %v1631_v52  ;;  %v222_v42 = vld [vmem:[#allocation5 + $0x3b8] sm:$0xff]  ;;  %v1649_v44 = vpack.c.bf16 %v213_v38, %v209_v36  ;;  %v1459_v45 = vpack.c.bf16 %v220_v40, %v216_v39  ;;  %v215_v46 = vld [vmem:[#allocation5 + $0x380] sm:$0xff]  ;;  %v217_v48 = vld [vmem:[#allocation5 + $0x390] sm:$0xff] }
  0x84   :  { %v219_v47 = vld [vmem:[#allocation5 + $0x3a0] sm:$0xff]  ;;  %v1651_v49 = vpack.c.bf16 %v222_v42, %v218_v41  ;;  %v221_v50 = vld [vmem:[#allocation5 + $0x3b0] sm:$0xff]  ;;  %v224_v51 = vld [vmem:[#allocation5 + $0x3c8] sm:$0xff] }
  0x85   :  { %1442 = vmatpush1.bf16.msra.mxu0 %v1441_v58  ;;  %v228_v52 = vld [vmem:[#allocation5 + $0x3e8] sm:$0xff]  ;;  %v226_v53 = vld [vmem:[#allocation5 + $0x3d8] sm:$0xff]  ;;  %v1461_v55 = vpack.c.bf16 %v219_v47, %v215_v46  ;;  %v1653_v56 = vpack.c.bf16 %v221_v50, %v217_v48  ;;  %v223_v58 = vld [vmem:[#allocation5 + $0x3c0] sm:$0xff] }
  0x86   :  { %1634 = vmatpush1.bf16.msra.mxu1 %v1633_v59  ;;  %1444 = vmatprep.subr.bf16.mxu0 %v1443_v60  ;;  %v230_v54 = vld [vmem:[#allocation5 + $0x3f8] sm:$0xff]  ;;  %v1463_v57 = vpack.c.bf16 %v228_v52, %v224_v51  ;;  %v227_v59 = vld [vmem:[#allocation5 + $0x3e0] sm:$0xff]  ;;  %v225_v60 = vld [vmem:[#allocation5 + $0x3d0] sm:$0xff] }
  0x87   :  { %1636 = vmatprep.subr.bf16.mxu1 %v1635_v0  ;;  %v1655_v61 = vpack.c.bf16 %v230_v54, %v226_v53  ;;  %v229_v62 = vld [vmem:[#allocation5 + $0x3f0] sm:$0xff]  ;;  %v232_v63 = vld [vmem:[#allocation5 + $0x408] sm:$0xff]  ;;  %v234_v1 = vld [vmem:[#allocation5 + $0x418] sm:$0xff]  ;;  %v1465_v3 = vpack.c.bf16 %v227_v59, %v223_v58 }
  0x88   :  { %v236_v0 = vld [vmem:[#allocation5 + $0x428] sm:$0xff]  ;;  %v238_v2 = vld [vmem:[#allocation5 + $0x438] sm:$0xff]  ;;  %v1657_v4 = vpack.c.bf16 %v229_v62, %v225_v60  ;;  %v235_v7 = vld [vmem:[#allocation5 + $0x420] sm:$0xff] }
  0x89   :  { %1446 = vmatpush1.bf16.msra.mxu0 %v1445_v6  ;;  %v1467_v5 = vpack.c.bf16 %v236_v0, %v232_v63  ;;  %v231_v6 = vld [vmem:[#allocation5 + $0x400] sm:$0xff]  ;;  %v237_v10 = vld [vmem:[#allocation5 + $0x430] sm:$0xff]  ;;  %v240_v11 = vld [vmem:[#allocation5 + $0x448] sm:$0xff] }
  0x8a   :  { %1638 = vmatpush1.bf16.msra.mxu1 %v1637_v8  ;;  %1448 = vmatprep.subr.bf16.mxu0 %v1447_v9  ;;  %v233_v8 = vld [vmem:[#allocation5 + $0x410] sm:$0xff]  ;;  %v1659_v9 = vpack.c.bf16 %v238_v2, %v234_v1  ;;  %v244_v12 = vld [vmem:[#allocation5 + $0x468] sm:$0xff]  ;;  %v246_v14 = vld [vmem:[#allocation5 + $0x478] sm:$0xff]  ;;  %v1469_v16 = vpack.c.bf16 %v235_v7, %v231_v6 }
  0x8b   :  { %1640 = vmatprep.subr.bf16.mxu1 %v1639_v13  ;;  %v242_v13 = vld [vmem:[#allocation5 + $0x458] sm:$0xff]  ;;  %v85_v15 = vld [vmem:[#allocation2] sm:$0xff]  ;;  %v1661_v17 = vpack.c.bf16 %v237_v10, %v233_v8  ;;  %v1471_v18 = vpack.c.bf16 %v244_v12, %v240_v11  ;;  %v248_v24 = vld [vmem:[#allocation5 + $0x488] sm:$0xff] }
  0x8c   :  { %v1663_v22 = vpack.c.bf16 %v246_v14, %v242_v13  ;;  %v245_v23 = vld [vmem:[#allocation5 + $0x470] sm:$0xff]  ;;  %v250_v26 = vld [vmem:[#allocation5 + $0x498] sm:$0xff]  ;;  %v256_v36 = vld [vmem:[#allocation5 + $0x4c8] sm:$0xff] }
  0x8d   :  { %1450 = vmatpush1.bf16.msra.mxu0 %v1449_v19  ;;  %v239_v19 = vld [vmem:[#allocation5 + $0x440] sm:$0xff]  ;;  %v254_v27 = vld [vmem:[#allocation5 + $0x4b8] sm:$0xff]  ;;  %v253_v35 = vld [vmem:[#allocation5 + $0x4b0] sm:$0xff] }
  0x8e   :  { %1642 = vmatpush1.bf16.msra.mxu1 %v1641_v20  ;;  %1452 = vmatprep.subr.bf16.mxu0 %v1451_v21  ;;  %v243_v20 = vld [vmem:[#allocation5 + $0x460] sm:$0xff]  ;;  %v241_v21 = vld [vmem:[#allocation5 + $0x450] sm:$0xff]  ;;  %v1667_v34 = vpack.c.bf16 %v254_v27, %v250_v26  ;;  %v258_v38 = vld [vmem:[#allocation5 + $0x4d8] sm:$0xff] }
  0x8f   :  { %1644 = vmatprep.subr.bf16.mxu1 %v1643_v25  ;;  %v252_v25 = vld [vmem:[#allocation5 + $0x4a8] sm:$0xff]  ;;  %v1473_v28 = vpack.c.bf16 %v243_v20, %v239_v19  ;;  %v1665_v29 = vpack.c.bf16 %v245_v23, %v241_v21  ;;  %v262_v39 = vld [vmem:[#allocation5 + $0x4f8] sm:$0xff]  ;;  %v261_v47 = vld [vmem:[#allocation5 + $0x4f0] sm:$0xff] }
  0x90   :  { %v1475_v30 = vpack.c.bf16 %v252_v25, %v248_v24  ;;  %v1671_v46 = vpack.c.bf16 %v262_v39, %v258_v38  ;;  %v264_v48 = vld [vmem:[#allocation5 + $0x508] sm:$0xff]  ;;  %v266_v50 = vld [vmem:[#allocation5 + $0x518] sm:$0xff]  ;;  %v269_v59 = vld [vmem:[#allocation5 + $0x530] sm:$0xff] }
  0x91   :  { %1454 = vmatpush1.bf16.msra.mxu0 %v1453_v31  ;;  %v247_v31 = vld [vmem:[#allocation5 + $0x480] sm:$0xff]  ;;  %v270_v51 = vld [vmem:[#allocation5 + $0x538] sm:$0xff]  ;;  %v272_v60 = vld [vmem:[#allocation5 + $0x548] sm:$0xff] }
  0x92   :  { %1646 = vmatpush1.bf16.msra.mxu1 %v1645_v32  ;;  %1456 = vmatprep.subr.bf16.mxu0 %v1455_v33  ;;  %v251_v32 = vld [vmem:[#allocation5 + $0x4a0] sm:$0xff]  ;;  %v249_v33 = vld [vmem:[#allocation5 + $0x490] sm:$0xff]  ;;  %v1675_v58 = vpack.c.bf16 %v270_v51, %v266_v50  ;;  %v274_v62 = vld [vmem:[#allocation5 + $0x558] sm:$0xff] }
  0x93   :  { %1648 = vmatprep.subr.bf16.mxu1 %v1647_v37  ;;  %v260_v37 = vld [vmem:[#allocation5 + $0x4e8] sm:$0xff]  ;;  %v1477_v40 = vpack.c.bf16 %v251_v32, %v247_v31  ;;  %v1669_v41 = vpack.c.bf16 %v253_v35, %v249_v33  ;;  %v278_v63 = vld [vmem:[#allocation5 + $0x578] sm:$0xff]  ;;  %v271_v1 = vld [vmem:[#allocation5 + $0x540] sm:$0xff] }
  0x94   :  { %v1479_v42 = vpack.c.bf16 %v260_v37, %v256_v36  ;;  %v92_v2 = vld [vmem:[#allocation2 + $0x38] sm:$0xff]  ;;  %v273_v6 = vld [vmem:[#allocation5 + $0x550] sm:$0xff]  ;;  %v1679_v8 = vpack.c.bf16 %v278_v63, %v274_v62  ;;  %v91_v11 = vld [vmem:[#allocation2 + $0x30] sm:$0xff] }
  0x95   :  { %1458 = vmatpush1.bf16.msra.mxu0 %v1457_v43  ;;  %v255_v43 = vld [vmem:[#allocation5 + $0x4c0] sm:$0xff]  ;;  %v277_v7 = vld [vmem:[#allocation5 + $0x570] sm:$0xff]  ;;  %v284_v10 = vld [vmem:[#allocation5 + $0x5a8] sm:$0xff] }
  0x96   :  { %1650 = vmatpush1.bf16.msra.mxu1 %v1649_v44  ;;  %1460 = vmatprep.subr.bf16.mxu0 %v1459_v45  ;;  %v259_v44 = vld [vmem:[#allocation5 + $0x4e0] sm:$0xff]  ;;  %v257_v45 = vld [vmem:[#allocation5 + $0x4d0] sm:$0xff]  ;;  %v282_v12 = vld [vmem:[#allocation5 + $0x598] sm:$0xff] }
  0x97   :  { %1652 = vmatprep.subr.bf16.mxu1 %v1651_v49  ;;  %v268_v49 = vld [vmem:[#allocation5 + $0x528] sm:$0xff]  ;;  %v1481_v52 = vpack.c.bf16 %v259_v44, %v255_v43  ;;  %v1673_v53 = vpack.c.bf16 %v261_v47, %v257_v45  ;;  %v286_v13 = vld [vmem:[#allocation5 + $0x5b8] sm:$0xff]  ;;  %v283_v19 = vld [vmem:[#allocation5 + $0x5a0] sm:$0xff] }
  0x98   :  { %v1483_v54 = vpack.c.bf16 %v268_v49, %v264_v48  ;;  %v281_v20 = vld [vmem:[#allocation5 + $0x590] sm:$0xff]  ;;  %v288_v24 = vld [vmem:[#allocation5 + $0x5c8] sm:$0xff]  ;;  %v290_v26 = vld [vmem:[#allocation5 + $0x5d8] sm:$0xff] }
  0x99   :  { %1462 = vmatpush1.bf16.msra.mxu0 %v1461_v55  ;;  %v263_v55 = vld [vmem:[#allocation5 + $0x500] sm:$0xff]  ;;  %v97_v21 = vld [vmem:[#allocation2 + $0x60] sm:$0xf]  ;;  %v292_v25 = vld [vmem:[#allocation5 + $0x5e8] sm:$0xff] }
  0x9a   :  { %1654 = vmatpush1.bf16.msra.mxu1 %v1653_v56  ;;  %1464 = vmatprep.subr.bf16.mxu0 %v1463_v57  ;;  %v267_v56 = vld [vmem:[#allocation5 + $0x520] sm:$0xff]  ;;  %v265_v57 = vld [vmem:[#allocation5 + $0x510] sm:$0xff]  ;;  %v294_v27 = vld [vmem:[#allocation5 + $0x5f8] sm:$0xff]  ;;  %v1495_v31 = vpack.c.bf16 %v292_v25, %v288_v24 }
  0x9b   :  { %1656 = vmatprep.subr.bf16.mxu1 %v1655_v61  ;;  %v276_v61 = vld [vmem:[#allocation5 + $0x568] sm:$0xff]  ;;  %v1485_v0 = vpack.c.bf16 %v267_v56, %v263_v55  ;;  %v285_v23 = vld [vmem:[#allocation5 + $0x5b0] sm:$0xff]  ;;  %v287_v32 = vld [vmem:[#allocation5 + $0x5c0] sm:$0xff]  ;;  %v1687_v35 = vpack.c.bf16 %v294_v27, %v290_v26 }
  0x9c   :  { %v291_v33 = vld [vmem:[#allocation5 + $0x5e0] sm:$0xff]  ;;  %v293_v36 = vld [vmem:[#allocation5 + $0x5f0] sm:$0xff]  ;;  %v296_v37 = vld [vmem:[#allocation5 + $0x608] sm:$0xff] }
  0x9d   :  { %1466 = vmatpush1.bf16.msra.mxu0 %v1465_v3  ;;  %v1677_v3 = vpack.c.bf16 %v269_v59, %v265_v57  ;;  %v300_v38 = vld [vmem:[#allocation5 + $0x628] sm:$0xff]  ;;  %v298_v39 = vld [vmem:[#allocation5 + $0x618] sm:$0xff]  ;;  %v295_v44 = vld [vmem:[#allocation5 + $0x600] sm:$0xff] }
  0x9e   :  { %1658 = vmatpush1.bf16.msra.mxu1 %v1657_v4  ;;  %1468 = vmatprep.subr.bf16.mxu0 %v1467_v5  ;;  %v1487_v4 = vpack.c.bf16 %v276_v61, %v272_v60  ;;  %v275_v5 = vld [vmem:[#allocation5 + $0x560] sm:$0xff]  ;;  %v1499_v43 = vpack.c.bf16 %v300_v38, %v296_v37  ;;  %v301_v48 = vld [vmem:[#allocation5 + $0x630] sm:$0xff]  ;;  %v304_v49 = vld [vmem:[#allocation5 + $0x648] sm:$0xff] }
  0x9f   :  { %1660 = vmatprep.subr.bf16.mxu1 %v1659_v9  ;;  %v280_v9 = vld [vmem:[#allocation5 + $0x588] sm:$0xff]  ;;  %v1489_v14 = vpack.c.bf16 %v275_v5, %v271_v1  ;;  %v299_v45 = vld [vmem:[#allocation5 + $0x620] sm:$0xff]  ;;  %v306_v51 = vld [vmem:[#allocation5 + $0x658] sm:$0xff] }
  0xa0   :  { %574 = vmatmul.mubr.f32.vlgmr.msra.gmra.mrb[0].mxu0 %v85_v15  ;;  %v308_v50 = vld [vmem:[#allocation5 + $0x668] sm:$0xff]  ;;  %v303_v56 = vld [vmem:[#allocation5 + $0x640] sm:$0xff]  ;;  %v309_v60 = vld [vmem:[#allocation5 + $0x670] sm:$0xff] }
  0xa1   :  { %1470 = vmatpush1.bf16.msra.mxu0 %v1469_v16  ;;  %823 = vmatmul.mubr.f32.vlgmr.msra.gmra.mrb[0].mxu1 %v85_v15  ;;  %v279_v15 = vld [vmem:[#allocation5 + $0x580] sm:$0xff]  ;;  %v98_v16 = vld [vmem:[#allocation2 + $0x68] sm:$0xf]  ;;  %v1503_v55 = vpack.c.bf16 %v308_v50, %v304_v49  ;;  %v312_v61 = vld [vmem:[#allocation5 + $0x688] sm:$0xff] }
  0xa2   :  { %1662 = vmatpush1.bf16.msra.mxu1 %v1661_v17  ;;  %1472 = vmatprep.subr.bf16.mxu0 %v1471_v18  ;;  %v1681_v17 = vpack.c.bf16 %v277_v7, %v273_v6  ;;  %v1491_v18 = vpack.c.bf16 %v284_v10, %v280_v9  ;;  %v307_v57 = vld [vmem:[#allocation5 + $0x660] sm:$0xff]  ;;  %v316_v62 = vld [vmem:[#allocation5 + $0x6a8] sm:$0xff]  ;;  %v314_v63 = vld [vmem:[#allocation5 + $0x698] sm:$0xff] }
  0xa3   :  { %1664 = vmatprep.subr.bf16.mxu1 %v1663_v22  ;;  %579 = vmatprep.mubr.f32.mxu0 %v92_v2  ;;  %v1683_v22 = vpack.c.bf16 %v286_v13, %v282_v12  ;;  %v1505_v1 = vpack.c.bf16 %v307_v57, %v303_v56  ;;  %v315_v5 = vld [vmem:[#allocation5 + $0x6a0] sm:$0xff]  ;;  %v313_v6 = vld [vmem:[#allocation5 + $0x690] sm:$0xff]  ;;  %v320_v9 = vld [vmem:[#allocation5 + $0x6c8] sm:$0xff] }
  0xa4   :  { %828 = vmatprep.mubr.f32.mxu1 %v92_v2  ;;  %580 = vmatmul.mubr.f32.gmra.mrb[2].mxu0 %v91_v11  ;;  %v324_v10 = vld [vmem:[#allocation5 + $0x6e8] sm:$0xff]  ;;  %v326_v12 = vld [vmem:[#allocation5 + $0x6f8] sm:$0xff]  ;;  %v349_v56 = vld [vmem:[#allocation5 + $0x7b0] sm:$0xff] }
  0xa5   :  { %1474 = vmatpush1.bf16.msra.mxu0 %v1473_v28  ;;  %829 = vmatmul.mubr.f32.gmra.mrb[2].mxu1 %v91_v11  ;;  %v88_v28 = vld [vmem:[#allocation2 + $0x18] sm:$0xff]  ;;  %v322_v11 = vld [vmem:[#allocation5 + $0x6d8] sm:$0xff] }
  0xa6   :  { %1666 = vmatpush1.bf16.msra.mxu1 %v1665_v29  ;;  %1476 = vmatprep.subr.bf16.mxu0 %v1475_v30  ;;  %v1493_v29 = vpack.c.bf16 %v283_v19, %v279_v15  ;;  %v1685_v30 = vpack.c.bf16 %v285_v23, %v281_v20  ;;  %v1511_v15 = vpack.c.bf16 %v324_v10, %v320_v9  ;;  %v325_v20 = vld [vmem:[#allocation5 + $0x6f0] sm:$0xff]  ;;  %v330_v23 = vld [vmem:[#allocation5 + $0x718] sm:$0xff]  ;;  %v352_v57 = vld [vmem:[#allocation5 + $0x7c8] sm:$0xff] }
  0xa7   :  { %1668 = vmatprep.subr.bf16.mxu1 %v1667_v34  ;;  %585 = vmatprep.mubr.f32.mxu0 %v98_v16  ;;  %v289_v34 = vld [vmem:[#allocation5 + $0x5d0] sm:$0xff]  ;;  %v1703_v19 = vpack.c.bf16 %v326_v12, %v322_v11  ;;  %v334_v24 = vld [vmem:[#allocation5 + $0x738] sm:$0xff]  ;;  %v359_v12 = vld [vmem:[#allocation5 + $0x800] sm:$0xff] }
  0xa8   :  { %834 = vmatprep.mubr.f32.mxu1 %v98_v16  ;;  %586 = vmatmul.mubr.f32.gmra.mrb[4].mxu0 %v97_v21  ;;  %v319_v16 = vld [vmem:[#allocation5 + $0x6c0] sm:$0xff] }
  0xa9   :  { %1478 = vmatpush1.bf16.msra.mxu0 %v1477_v40  ;;  %835 = vmatmul.mubr.f32.gmra.mrb[4].mxu1 %v97_v21  ;;  %v302_v40 = vld [vmem:[#allocation5 + $0x638] sm:$0xff]  ;;  %v328_v21 = vld [vmem:[#allocation5 + $0x708] sm:$0xff] }
  0xaa   :  { %1670 = vmatpush1.bf16.msra.mxu1 %v1669_v41  ;;  %1480 = vmatprep.subr.bf16.mxu0 %v1479_v42  ;;  %v1497_v41 = vpack.c.bf16 %v291_v33, %v287_v32  ;;  %v1689_v42 = vpack.c.bf16 %v293_v36, %v289_v34  ;;  %v1691_v47 = vpack.c.bf16 %v302_v40, %v298_v39  ;;  %v333_v32 = vld [vmem:[#allocation5 + $0x730] sm:$0xff]  ;;  %v336_v33 = vld [vmem:[#allocation5 + $0x748] sm:$0xff]  ;;  %v342_v36 = vld [vmem:[#allocation5 + $0x778] sm:$0xff] }
  0xab   :  { %1672 = vmatprep.subr.bf16.mxu1 %v1671_v46  ;;  %656 = vmatprep.mubr.f32.mxu0 %v88_v28  ;;  %v297_v46 = vld [vmem:[#allocation5 + $0x610] sm:$0xff]  ;;  %v340_v34 = vld [vmem:[#allocation5 + $0x768] sm:$0xff]  ;;  %v335_v40 = vld [vmem:[#allocation5 + $0x740] sm:$0xff] }
  0xac   :  { %905 = vmatprep.mubr.f32.mxu1 %v88_v28  ;;  %v327_v28 = vld [vmem:[#allocation5 + $0x700] sm:$0xff]  ;;  %v1519_v39 = vpack.c.bf16 %v340_v34, %v336_v33  ;;  %v382_v33 = vld [vmem:[#allocation5 + $0x8b8] sm:$0xff] }
  0xad   :  { %1482 = vmatpush1.bf16.msra.mxu0 %v1481_v52  ;;  %v310_v52 = vld [vmem:[#allocation5 + $0x678] sm:$0xff] }
  0xae   :  { %1674 = vmatpush1.bf16.msra.mxu1 %v1673_v53  ;;  %1484 = vmatprep.subr.bf16.mxu0 %v1483_v54  ;;  %v1501_v53 = vpack.c.bf16 %v299_v45, %v295_v44  ;;  %v1693_v54 = vpack.c.bf16 %v301_v48, %v297_v46  ;;  %v1695_v59 = vpack.c.bf16 %v310_v52, %v306_v51  ;;  %v341_v44 = vld [vmem:[#allocation5 + $0x770] sm:$0xff]  ;;  %v344_v45 = vld [vmem:[#allocation5 + $0x788] sm:$0xff]  ;;  %v350_v48 = vld [vmem:[#allocation5 + $0x7b8] sm:$0xff] }
  0xaf   :  { %1676 = vmatprep.subr.bf16.mxu1 %v1675_v58  ;;  %v305_v58 = vld [vmem:[#allocation5 + $0x650] sm:$0xff]  ;;  %v348_v46 = vld [vmem:[#allocation5 + $0x7a8] sm:$0xff]  ;;  %v343_v52 = vld [vmem:[#allocation5 + $0x780] sm:$0xff] }
  0xb0   :  { %v1697_v2 = vpack.c.bf16 %v309_v60, %v305_v58  ;;  %v1523_v51 = vpack.c.bf16 %v348_v46, %v344_v45  ;;  %v356_v58 = vld [vmem:[#allocation5 + $0x7e8] sm:$0xff]  ;;  %v358_v60 = vld [vmem:[#allocation5 + $0x7f8] sm:$0xff] }
  0xb1   :  { %1486 = vmatpush1.bf16.msra.mxu0 %v1485_v0  ;;  %v318_v0 = vld [vmem:[#allocation5 + $0x6b8] sm:$0xff]  ;;  %v388_v45 = vld [vmem:[#allocation5 + $0x8e8] sm:$0xff] }
  0xb2   :  { %1678 = vmatpush1.bf16.msra.mxu1 %v1677_v3  ;;  %1488 = vmatprep.subr.bf16.mxu0 %v1487_v4  ;;  %v1507_v3 = vpack.c.bf16 %v316_v62, %v312_v61  ;;  %v311_v4 = vld [vmem:[#allocation5 + $0x680] sm:$0xff]  ;;  %v1699_v7 = vpack.c.bf16 %v318_v0, %v314_v63  ;;  %v1527_v63 = vpack.c.bf16 %v356_v58, %v352_v57  ;;  %v94_v34 = vld [vmem:[#allocation2 + $0x48] sm:$0xff]  ;;  %v389_v57 = vld [vmem:[#allocation5 + $0x8f0] sm:$0xff] }
  0xb3   :  { %1680 = vmatprep.subr.bf16.mxu1 %v1679_v8  ;;  %v317_v8 = vld [vmem:[#allocation5 + $0x6b0] sm:$0xff]  ;;  %v1509_v13 = vpack.c.bf16 %v315_v5, %v311_v4  ;;  %v351_v0 = vld [vmem:[#allocation5 + $0x7c0] sm:$0xff]  ;;  %v360_v5 = vld [vmem:[#allocation5 + $0x808] sm:$0xff] }
  0xb4   :  { %v357_v4 = vld [vmem:[#allocation5 + $0x7f0] sm:$0xff]  ;;  %v386_v46 = vld [vmem:[#allocation5 + $0x8d8] sm:$0xff]  ;;  %v392_v58 = vld [vmem:[#allocation5 + $0x908] sm:$0xff] }
  0xb5   :  { %1490 = vmatpush1.bf16.msra.mxu0 %v1489_v14  ;;  %v1701_v14 = vpack.c.bf16 %v317_v8, %v313_v6  ;;  %v364_v6 = vld [vmem:[#allocation5 + $0x828] sm:$0xff]  ;;  %v366_v8 = vld [vmem:[#allocation5 + $0x838] sm:$0xff] }
  0xb6   :  { %1682 = vmatpush1.bf16.msra.mxu1 %v1681_v17  ;;  %1492 = vmatprep.subr.bf16.mxu0 %v1491_v18  ;;  %v323_v17 = vld [vmem:[#allocation5 + $0x6e0] sm:$0xff]  ;;  %v321_v18 = vld [vmem:[#allocation5 + $0x6d0] sm:$0xff]  ;;  %v1531_v11 = vpack.c.bf16 %v364_v6, %v360_v5 }
  0xb7   :  { %1684 = vmatprep.subr.bf16.mxu1 %v1683_v22  ;;  %v332_v22 = vld [vmem:[#allocation5 + $0x728] sm:$0xff]  ;;  %v1513_v25 = vpack.c.bf16 %v323_v17, %v319_v16  ;;  %v1705_v26 = vpack.c.bf16 %v325_v20, %v321_v18  ;;  %v365_v16 = vld [vmem:[#allocation5 + $0x830] sm:$0xff]  ;;  %v374_v20 = vld [vmem:[#allocation5 + $0x878] sm:$0xff] }
  0xb8   :  { %v1515_v27 = vpack.c.bf16 %v332_v22, %v328_v21  ;;  %v368_v17 = vld [vmem:[#allocation5 + $0x848] sm:$0xff]  ;;  %v87_v21 = vld [vmem:[#allocation2 + $0x10] sm:$0xff]  ;;  %v397_v6 = vld [vmem:[#allocation5 + $0x930] sm:$0xff] }
  0xb9   :  { %1494 = vmatpush1.bf16.msra.mxu0 %v1493_v29  ;;  %v331_v29 = vld [vmem:[#allocation5 + $0x720] sm:$0xff]  ;;  %v372_v18 = vld [vmem:[#allocation5 + $0x868] sm:$0xff] }
  0xba   :  { %1686 = vmatpush1.bf16.msra.mxu1 %v1685_v30  ;;  %1496 = vmatprep.subr.bf16.mxu0 %v1495_v31  ;;  %v329_v30 = vld [vmem:[#allocation5 + $0x710] sm:$0xff]  ;;  %v1707_v31 = vpack.c.bf16 %v334_v24, %v330_v23  ;;  %v1517_v37 = vpack.c.bf16 %v331_v29, %v327_v28  ;;  %v1535_v24 = vpack.c.bf16 %v372_v18, %v368_v17 }
  0xbb   :  { %1688 = vmatprep.subr.bf16.mxu1 %v1687_v35  ;;  %v338_v35 = vld [vmem:[#allocation5 + $0x758] sm:$0xff]  ;;  %v1709_v38 = vpack.c.bf16 %v333_v32, %v329_v30  ;;  %v373_v29 = vld [vmem:[#allocation5 + $0x870] sm:$0xff]  ;;  %v376_v30 = vld [vmem:[#allocation5 + $0x888] sm:$0xff] }
  0xbc   :  { %v378_v32 = vld [vmem:[#allocation5 + $0x898] sm:$0xff]  ;;  %v405_v18 = vld [vmem:[#allocation5 + $0x970] sm:$0xff] }
  0xbd   :  { %1498 = vmatpush1.bf16.msra.mxu0 %v1497_v41  ;;  %v339_v41 = vld [vmem:[#allocation5 + $0x760] sm:$0xff] }
  0xbe   :  { %1690 = vmatpush1.bf16.msra.mxu1 %v1689_v42  ;;  %1500 = vmatprep.subr.bf16.mxu0 %v1499_v43  ;;  %v337_v42 = vld [vmem:[#allocation5 + $0x750] sm:$0xff]  ;;  %v1711_v43 = vpack.c.bf16 %v342_v36, %v338_v35  ;;  %v1521_v49 = vpack.c.bf16 %v339_v41, %v335_v40  ;;  %v379_v40 = vld [vmem:[#allocation5 + $0x8a0] sm:$0xff] }
  0xbf   :  { %1692 = vmatprep.subr.bf16.mxu1 %v1691_v47  ;;  %v346_v47 = vld [vmem:[#allocation5 + $0x798] sm:$0xff]  ;;  %v1713_v50 = vpack.c.bf16 %v341_v44, %v337_v42  ;;  %v93_v36 = vld [vmem:[#allocation2 + $0x40] sm:$0xff]  ;;  %v1731_v42 = vpack.c.bf16 %v382_v33, %v378_v32  ;;  %v384_v44 = vld [vmem:[#allocation5 + $0x8c8] sm:$0xff] }
  0xc0   :  { %v377_v41 = vld [vmem:[#allocation5 + $0x890] sm:$0xff]  ;;  %v420_v32 = vld [vmem:[#allocation5 + $0x9e8] sm:$0xff]  ;;  %v418_v33 = vld [vmem:[#allocation5 + $0x9d8] sm:$0xff] }
  0xc1   :  { %1502 = vmatpush1.bf16.msra.mxu0 %v1501_v53  ;;  %v347_v53 = vld [vmem:[#allocation5 + $0x7a0] sm:$0xff] }
  0xc2   :  { %1694 = vmatpush1.bf16.msra.mxu1 %v1693_v54  ;;  %1504 = vmatprep.subr.bf16.mxu0 %v1503_v55  ;;  %v345_v54 = vld [vmem:[#allocation5 + $0x790] sm:$0xff]  ;;  %v1715_v55 = vpack.c.bf16 %v350_v48, %v346_v47  ;;  %v1525_v61 = vpack.c.bf16 %v347_v53, %v343_v52  ;;  %v390_v47 = vld [vmem:[#allocation5 + $0x8f8] sm:$0xff]  ;;  %v100_v48 = vld [vmem:[#allocation2 + $0x78] sm:$0xf]  ;;  %v1543_v52 = vpack.c.bf16 %v388_v45, %v384_v44 }
  0xc3   :  { %1696 = vmatprep.subr.bf16.mxu1 %v1695_v59  ;;  %v354_v59 = vld [vmem:[#allocation5 + $0x7d8] sm:$0xff]  ;;  %v1717_v62 = vpack.c.bf16 %v349_v56, %v345_v54  ;;  %v383_v53 = vld [vmem:[#allocation5 + $0x8c0] sm:$0xff]  ;;  %v1735_v56 = vpack.c.bf16 %v390_v47, %v386_v46  ;;  %v428_v44 = vld [vmem:[#allocation5 + $0xa28] sm:$0xff] }
  0xc4   :  { %v387_v54 = vld [vmem:[#allocation5 + $0x8e0] sm:$0xff]  ;;  %v426_v45 = vld [vmem:[#allocation5 + $0xa18] sm:$0xff] }
  0xc5   :  { %1506 = vmatpush1.bf16.msra.mxu0 %v1505_v1  ;;  %v355_v1 = vld [vmem:[#allocation5 + $0x7e0] sm:$0xff]  ;;  %v430_v46 = vld [vmem:[#allocation5 + $0xa38] sm:$0xff] }
  0xc6   :  { %1698 = vmatpush1.bf16.msra.mxu1 %v1697_v2  ;;  %1508 = vmatprep.subr.bf16.mxu0 %v1507_v3  ;;  %v353_v2 = vld [vmem:[#allocation5 + $0x7d0] sm:$0xff]  ;;  %v1719_v3 = vpack.c.bf16 %v358_v60, %v354_v59  ;;  %v1529_v9 = vpack.c.bf16 %v355_v1, %v351_v0  ;;  %v396_v59 = vld [vmem:[#allocation5 + $0x928] sm:$0xff]  ;;  %v394_v60 = vld [vmem:[#allocation5 + $0x918] sm:$0xff] }
  0xc7   :  { %1700 = vmatprep.subr.bf16.mxu1 %v1699_v7  ;;  %v362_v7 = vld [vmem:[#allocation5 + $0x818] sm:$0xff]  ;;  %v1721_v10 = vpack.c.bf16 %v357_v4, %v353_v2  ;;  %v1547_v1 = vpack.c.bf16 %v396_v59, %v392_v58  ;;  %v391_v2 = vld [vmem:[#allocation5 + $0x900] sm:$0xff]  ;;  %v393_v4 = vld [vmem:[#allocation5 + $0x910] sm:$0xff] }
  0xc8   :  { %v438_v58 = vld [vmem:[#allocation5 + $0xa78] sm:$0xff] }
  0xc9   :  { %1510 = vmatpush1.bf16.msra.mxu0 %v1509_v13  ;;  %v363_v13 = vld [vmem:[#allocation5 + $0x820] sm:$0xff] }
  0xca   :  { %1702 = vmatpush1.bf16.msra.mxu1 %v1701_v14  ;;  %1512 = vmatprep.subr.bf16.mxu0 %v1511_v15  ;;  %v361_v14 = vld [vmem:[#allocation5 + $0x810] sm:$0xff]  ;;  %v1723_v15 = vpack.c.bf16 %v366_v8, %v362_v7  ;;  %v1533_v22 = vpack.c.bf16 %v363_v13, %v359_v12  ;;  %v400_v7 = vld [vmem:[#allocation5 + $0x948] sm:$0xff]  ;;  %v1741_v12 = vpack.c.bf16 %v397_v6, %v393_v4  ;;  %v446_v6 = vld [vmem:[#allocation5 + $0xab8] sm:$0xff] }
  0xcb   :  { %1704 = vmatprep.subr.bf16.mxu1 %v1703_v19  ;;  %v370_v19 = vld [vmem:[#allocation5 + $0x858] sm:$0xff]  ;;  %v1725_v23 = vpack.c.bf16 %v365_v16, %v361_v14  ;;  %v404_v8 = vld [vmem:[#allocation5 + $0x968] sm:$0xff]  ;;  %v399_v14 = vld [vmem:[#allocation5 + $0x940] sm:$0xff] }
  0xcc   :  { %v1727_v28 = vpack.c.bf16 %v374_v20, %v370_v19  ;;  %v1551_v13 = vpack.c.bf16 %v404_v8, %v400_v7  ;;  %v401_v16 = vld [vmem:[#allocation5 + $0x950] sm:$0xff]  ;;  %v408_v19 = vld [vmem:[#allocation5 + $0x988] sm:$0xff] }
  0xcd   :  { %1514 = vmatpush1.bf16.msra.mxu0 %v1513_v25  ;;  %v367_v25 = vld [vmem:[#allocation5 + $0x840] sm:$0xff]  ;;  %v412_v20 = vld [vmem:[#allocation5 + $0x9a8] sm:$0xff] }
  0xce   :  { %1706 = vmatpush1.bf16.msra.mxu1 %v1705_v26  ;;  %1516 = vmatprep.subr.bf16.mxu0 %v1515_v27  ;;  %v371_v26 = vld [vmem:[#allocation5 + $0x860] sm:$0xff]  ;;  %v369_v27 = vld [vmem:[#allocation5 + $0x850] sm:$0xff]  ;;  %v444_v4 = vld [vmem:[#allocation5 + $0xaa8] sm:$0xff] }
  0xcf   :  { %1708 = vmatprep.subr.bf16.mxu1 %v1707_v31  ;;  %v380_v31 = vld [vmem:[#allocation5 + $0x8a8] sm:$0xff]  ;;  %v1537_v35 = vpack.c.bf16 %v371_v26, %v367_v25  ;;  %v1555_v25 = vpack.c.bf16 %v412_v20, %v408_v19  ;;  %v407_v26 = vld [vmem:[#allocation5 + $0x980] sm:$0xff] }
  0xd1   :  { %1518 = vmatpush1.bf16.msra.mxu0 %v1517_v37  ;;  %v1729_v37 = vpack.c.bf16 %v373_v29, %v369_v27  ;;  %v411_v27 = vld [vmem:[#allocation5 + $0x9a0] sm:$0xff] }
  0xd2   :  { %1710 = vmatpush1.bf16.msra.mxu1 %v1709_v38  ;;  %1520 = vmatprep.subr.bf16.mxu0 %v1519_v39  ;;  %v1539_v38 = vpack.c.bf16 %v380_v31, %v376_v30  ;;  %v375_v39 = vld [vmem:[#allocation5 + $0x880] sm:$0xff]  ;;  %v413_v30 = vld [vmem:[#allocation5 + $0x9b0] sm:$0xff]  ;;  %v416_v31 = vld [vmem:[#allocation5 + $0x9c8] sm:$0xff] }
  0xd3   :  { %1712 = vmatprep.subr.bf16.mxu1 %v1711_v43  ;;  %v381_v43 = vld [vmem:[#allocation5 + $0x8b0] sm:$0xff] }
  0xd5   :  { %1522 = vmatpush1.bf16.msra.mxu0 %v1521_v49  ;;  %v1541_v49 = vpack.c.bf16 %v379_v40, %v375_v39  ;;  %v419_v39 = vld [vmem:[#allocation5 + $0x9e0] sm:$0xff]  ;;  %v417_v40 = vld [vmem:[#allocation5 + $0x9d0] sm:$0xff] }
  0xd6   :  { %1714 = vmatpush1.bf16.msra.mxu1 %v1713_v50  ;;  %1524 = vmatprep.subr.bf16.mxu0 %v1523_v51  ;;  %v99_v50 = vld [vmem:[#allocation2 + $0x70] sm:$0xf]  ;;  %v1733_v51 = vpack.c.bf16 %v381_v43, %v377_v41  ;;  %v424_v43 = vld [vmem:[#allocation5 + $0xa08] sm:$0xff] }
  0xd7   :  { %1716 = vmatprep.subr.bf16.mxu1 %v1715_v55  ;;  %v385_v55 = vld [vmem:[#allocation5 + $0x8d0] sm:$0xff] }
  0xd8   :  { %v1737_v0 = vpack.c.bf16 %v389_v57, %v385_v55  ;;  %v432_v55 = vld [vmem:[#allocation5 + $0xa48] sm:$0xff]  ;;  %v434_v57 = vld [vmem:[#allocation5 + $0xa58] sm:$0xff] }
  0xd9   :  { %1526 = vmatpush1.bf16.msra.mxu0 %v1525_v61  ;;  %v398_v61 = vld [vmem:[#allocation5 + $0x938] sm:$0xff] }
  0xda   :  { %1718 = vmatpush1.bf16.msra.mxu1 %v1717_v62  ;;  %1528 = vmatprep.subr.bf16.mxu0 %v1527_v63  ;;  %v90_v62 = vld [vmem:[#allocation2 + $0x28] sm:$0xff]  ;;  %v1545_v63 = vpack.c.bf16 %v387_v54, %v383_v53  ;;  %v1739_v5 = vpack.c.bf16 %v398_v61, %v394_v60  ;;  %v1755_v53 = vpack.c.bf16 %v430_v46, %v426_v45  ;;  %v429_v54 = vld [vmem:[#allocation5 + $0xa30] sm:$0xff]  ;;  %v463_v46 = vld [vmem:[#allocation5 + $0xb40] sm:$0xff] }
  0xdb   :  { %1720 = vmatprep.subr.bf16.mxu1 %v1719_v3  ;;  %v395_v3 = vld [vmem:[#allocation5 + $0x920] sm:$0xff] }
  0xdd   :  { %1530 = vmatpush1.bf16.msra.mxu0 %v1529_v9  ;;  %v402_v9 = vld [vmem:[#allocation5 + $0x958] sm:$0xff] }
  0xde   :  { %1722 = vmatpush1.bf16.msra.mxu1 %v1721_v10  ;;  %1532 = vmatprep.subr.bf16.mxu0 %v1531_v11  ;;  %v406_v10 = vld [vmem:[#allocation5 + $0x978] sm:$0xff]  ;;  %v1549_v11 = vpack.c.bf16 %v395_v3, %v391_v2  ;;  %v437_v2 = vld [vmem:[#allocation5 + $0xa70] sm:$0xff]  ;;  %v440_v3 = vld [vmem:[#allocation5 + $0xa88] sm:$0xff] }
  0xdf   :  { %1724 = vmatprep.subr.bf16.mxu1 %v1723_v15  ;;  %v403_v15 = vld [vmem:[#allocation5 + $0x960] sm:$0xff]  ;;  %v1743_v17 = vpack.c.bf16 %v406_v10, %v402_v9  ;;  %v1571_v9 = vpack.c.bf16 %v444_v4, %v440_v3 }
  0xe0   :  { %657 = vmatmul.mubr.f32.vlgmr.msra.gmra.mrb[0].mxu0 %v87_v21  ;;  %v439_v10 = vld [vmem:[#allocation5 + $0xa80] sm:$0xff] }
  0xe1   :  { %1534 = vmatpush1.bf16.msra.mxu0 %v1533_v22  ;;  %906 = vmatmul.mubr.f32.vlgmr.msra.gmra.mrb[0].mxu1 %v87_v21  ;;  %v410_v21 = vld [vmem:[#allocation5 + $0x998] sm:$0xff] }
  0xe2   :  { %1726 = vmatpush1.bf16.msra.mxu1 %v1725_v23  ;;  %1536 = vmatprep.subr.bf16.mxu0 %v1535_v24  ;;  %v414_v22 = vld [vmem:[#allocation5 + $0x9b8] sm:$0xff]  ;;  %v1553_v23 = vpack.c.bf16 %v403_v15, %v399_v14  ;;  %v1745_v24 = vpack.c.bf16 %v405_v18, %v401_v16  ;;  %v445_v14 = vld [vmem:[#allocation5 + $0xab0] sm:$0xff]  ;;  %v448_v15 = vld [vmem:[#allocation5 + $0xac8] sm:$0xff] }
  0xe3   :  { %1728 = vmatprep.subr.bf16.mxu1 %v1727_v28  ;;  %662 = vmatprep.mubr.f32.mxu0 %v94_v34  ;;  %v409_v28 = vld [vmem:[#allocation5 + $0x990] sm:$0xff]  ;;  %v1747_v29 = vpack.c.bf16 %v414_v22, %v410_v21  ;;  %v452_v16 = vld [vmem:[#allocation5 + $0xae8] sm:$0xff]  ;;  %v454_v18 = vld [vmem:[#allocation5 + $0xaf8] sm:$0xff] }
  0xe4   :  { %911 = vmatprep.mubr.f32.mxu1 %v94_v34  ;;  %663 = vmatmul.mubr.f32.gmra.mrb[2].mxu0 %v93_v36  ;;  %v422_v34 = vld [vmem:[#allocation5 + $0x9f8] sm:$0xff]  ;;  %v1575_v21 = vpack.c.bf16 %v452_v16, %v448_v15  ;;  %v447_v22 = vld [vmem:[#allocation5 + $0xac0] sm:$0xff] }
  0xe5   :  { %1538 = vmatpush1.bf16.msra.mxu0 %v1537_v35  ;;  %912 = vmatmul.mubr.f32.gmra.mrb[2].mxu1 %v93_v36  ;;  %v1557_v35 = vpack.c.bf16 %v411_v27, %v407_v26  ;;  %v1749_v36 = vpack.c.bf16 %v413_v30, %v409_v28  ;;  %v1751_v41 = vpack.c.bf16 %v422_v34, %v418_v33  ;;  %v453_v26 = vld [vmem:[#allocation5 + $0xaf0] sm:$0xff]  ;;  %v456_v27 = vld [vmem:[#allocation5 + $0xb08] sm:$0xff]  ;;  %v462_v30 = vld [vmem:[#allocation5 + $0xb38] sm:$0xff] }
  0xe6   :  { %1730 = vmatpush1.bf16.msra.mxu1 %v1729_v37  ;;  %1540 = vmatprep.subr.bf16.mxu0 %v1539_v38  ;;  %v1559_v37 = vpack.c.bf16 %v420_v32, %v416_v31  ;;  %v415_v38 = vld [vmem:[#allocation5 + $0x9c0] sm:$0xff]  ;;  %v460_v28 = vld [vmem:[#allocation5 + $0xb28] sm:$0xff] }
  0xe7   :  { %1732 = vmatprep.subr.bf16.mxu1 %v1731_v42  ;;  %668 = vmatprep.mubr.f32.mxu0 %v100_v48  ;;  %v421_v42 = vld [vmem:[#allocation5 + $0x9f0] sm:$0xff]  ;;  %v1561_v47 = vpack.c.bf16 %v419_v39, %v415_v38  ;;  %v1579_v33 = vpack.c.bf16 %v460_v28, %v456_v27  ;;  %v455_v34 = vld [vmem:[#allocation5 + $0xb00] sm:$0xff]  ;;  %v464_v39 = vld [vmem:[#allocation5 + $0xb48] sm:$0xff] }
  0xe8   :  { %917 = vmatprep.mubr.f32.mxu1 %v100_v48  ;;  %669 = vmatmul.mubr.f32.gmra.mrb[4].mxu0 %v99_v50  ;;  %v1753_v48 = vpack.c.bf16 %v421_v42, %v417_v40  ;;  %v461_v38 = vld [vmem:[#allocation5 + $0xb30] sm:$0xff]  ;;  %v468_v40 = vld [vmem:[#allocation5 + $0xb68] sm:$0xff]  ;;  %v470_v42 = vld [vmem:[#allocation5 + $0xb78] sm:$0xff] }
  0xe9   :  { %1542 = vmatpush1.bf16.msra.mxu0 %v1541_v49  ;;  %918 = vmatmul.mubr.f32.gmra.mrb[4].mxu1 %v99_v50  ;;  %v1563_v49 = vpack.c.bf16 %v428_v44, %v424_v43  ;;  %v423_v50 = vld [vmem:[#allocation5 + $0xa00] sm:$0xff]  ;;  %v1583_v45 = vpack.c.bf16 %v468_v40, %v464_v39  ;;  %v96_v28 = vld [vmem:[#allocation2 + $0x58] sm:$0xff] }
  0xea   :  { %1734 = vmatpush1.bf16.msra.mxu1 %v1733_v51  ;;  %1544 = vmatprep.subr.bf16.mxu0 %v1543_v52  ;;  %v427_v51 = vld [vmem:[#allocation5 + $0xa20] sm:$0xff]  ;;  %v425_v52 = vld [vmem:[#allocation5 + $0xa10] sm:$0xff] }
  0xeb   :  { %1736 = vmatprep.subr.bf16.mxu1 %v1735_v56  ;;  %739 = vmatprep.mubr.f32.mxu0 %v90_v62  ;;  %v436_v56 = vld [vmem:[#allocation5 + $0xa68] sm:$0xff]  ;;  %v1565_v59 = vpack.c.bf16 %v427_v51, %v423_v50  ;;  %v1757_v60 = vpack.c.bf16 %v429_v54, %v425_v52  ;;  %v469_v50 = vld [vmem:[#allocation5 + $0xb70] sm:$0xff]  ;;  %v478_v54 = vld [vmem:[#allocation5 + $0xbb8] sm:$0xff] }
  0xec   :  { %988 = vmatprep.mubr.f32.mxu1 %v90_v62  ;;  %v1567_v61 = vpack.c.bf16 %v436_v56, %v432_v55  ;;  %v431_v62 = vld [vmem:[#allocation5 + $0xa40] sm:$0xff]  ;;  %v472_v51 = vld [vmem:[#allocation5 + $0xb88] sm:$0xff] }
  0xed   :  { %1546 = vmatpush1.bf16.msra.mxu0 %v1545_v63  ;;  %v435_v63 = vld [vmem:[#allocation5 + $0xa60] sm:$0xff]  ;;  %v476_v52 = vld [vmem:[#allocation5 + $0xba8] sm:$0xff] }
  0xee   :  { %1738 = vmatpush1.bf16.msra.mxu1 %v1737_v0  ;;  %1548 = vmatprep.subr.bf16.mxu0 %v1547_v1  ;;  %v433_v0 = vld [vmem:[#allocation5 + $0xa50] sm:$0xff]  ;;  %v1759_v1 = vpack.c.bf16 %v438_v58, %v434_v57  ;;  %v1569_v7 = vpack.c.bf16 %v435_v63, %v431_v62  ;;  %v1587_v57 = vpack.c.bf16 %v476_v52, %v472_v51  ;;  %v471_v58 = vld [vmem:[#allocation5 + $0xb80] sm:$0xff]  ;;  %v480_v63 = vld [vmem:[#allocation5 + $0xbc8] sm:$0xff] }
  0xef   :  { %1740 = vmatprep.subr.bf16.mxu1 %v1739_v5  ;;  %v442_v5 = vld [vmem:[#allocation5 + $0xa98] sm:$0xff]  ;;  %v1761_v8 = vpack.c.bf16 %v437_v2, %v433_v0  ;;  %v477_v62 = vld [vmem:[#allocation5 + $0xbb0] sm:$0xff]  ;;  %v484_v0 = vld [vmem:[#allocation5 + $0xbe8] sm:$0xff] }
  0xf0   :  { %v486_v2 = vld [vmem:[#allocation5 + $0xbf8] sm:$0xff]  ;;  %v95_v39 = vld [vmem:[#allocation2 + $0x50] sm:$0xff]  ;;  %v101_v51 = vld [vmem:[#allocation2 + $0x80] sm:$0xf] }
  0xf1   :  { %1550 = vmatpush1.bf16.msra.mxu0 %v1549_v11  ;;  %v443_v11 = vld [vmem:[#allocation5 + $0xaa0] sm:$0xff] }
  0xf2   :  { %1742 = vmatpush1.bf16.msra.mxu1 %v1741_v12  ;;  %1552 = vmatprep.subr.bf16.mxu0 %v1551_v13  ;;  %v441_v12 = vld [vmem:[#allocation5 + $0xa90] sm:$0xff]  ;;  %v1763_v13 = vpack.c.bf16 %v446_v6, %v442_v5  ;;  %v1573_v19 = vpack.c.bf16 %v443_v11, %v439_v10  ;;  %v1591_v5 = vpack.c.bf16 %v484_v0, %v480_v63  ;;  %v479_v6 = vld [vmem:[#allocation5 + $0xbc0] sm:$0xff] }
  0xf3   :  { %1744 = vmatprep.subr.bf16.mxu1 %v1743_v17  ;;  %v450_v17 = vld [vmem:[#allocation5 + $0xad8] sm:$0xff]  ;;  %v1765_v20 = vpack.c.bf16 %v445_v14, %v441_v12  ;;  %v485_v10 = vld [vmem:[#allocation5 + $0xbf0] sm:$0xff]  ;;  %v1083_v11 = vld [vmem:[#allocation8 + $0x80] sm:$0xff] }
  0xf4   :  { %v1084_v12 = vld [vmem:[#allocation8 + $0x88] sm:$0xff]  ;;  %v1118_v27 = vld [vmem:[#allocation8 + $0x198] sm:$0xff]  ;;  %v1119_v40 = vld [vmem:[#allocation8 + $0x1a0] sm:$0xff] }
  0xf5   :  { %1554 = vmatpush1.bf16.msra.mxu0 %v1553_v23  ;;  %v451_v23 = vld [vmem:[#allocation5 + $0xae0] sm:$0xff]  ;;  %v1116_v14 = vld [vmem:[#allocation8 + $0x188] sm:$0xff]  ;;  %v1105_v63 = vld [vmem:[#allocation8 + $0x130] sm:$0xff] }
  0xf6   :  { %1746 = vmatpush1.bf16.msra.mxu1 %v1745_v24  ;;  %1556 = vmatprep.subr.bf16.mxu0 %v1555_v25  ;;  %v449_v24 = vld [vmem:[#allocation5 + $0xad0] sm:$0xff]  ;;  %v1767_v25 = vpack.c.bf16 %v454_v18, %v450_v17  ;;  %v1577_v31 = vpack.c.bf16 %v451_v23, %v447_v22  ;;  %v1787_v17 = vpack.c.bf16 %v1084_v12, %v1083_v11  ;;  %v1106_v0 = vld [vmem:[#allocation8 + $0x138] sm:$0xff]  ;;  %v1107_v11 = vld [vmem:[#allocation8 + $0x140] sm:$0xff] }
  0xf7   :  { %1748 = vmatprep.subr.bf16.mxu1 %v1747_v29  ;;  %v458_v29 = vld [vmem:[#allocation5 + $0xb18] sm:$0xff]  ;;  %v1769_v32 = vpack.c.bf16 %v453_v26, %v449_v24  ;;  %v1100_v22 = vld [vmem:[#allocation8 + $0x108] sm:$0xff] }
  0xf8   :  { %v1085_v23 = vld [vmem:[#allocation8 + $0x90] sm:$0xff]  ;;  %v1086_v24 = vld [vmem:[#allocation8 + $0x98] sm:$0xff]  ;;  %v1108_v12 = vld [vmem:[#allocation8 + $0x148] sm:$0xff] }
  0xf9   :  { %1558 = vmatpush1.bf16.msra.mxu0 %v1557_v35  ;;  %v459_v35 = vld [vmem:[#allocation5 + $0xb20] sm:$0xff]  ;;  %v1117_v26 = vld [vmem:[#allocation8 + $0x190] sm:$0xff] }
  0xfa   :  { %1750 = vmatpush1.bf16.msra.mxu1 %v1749_v36  ;;  %1560 = vmatprep.subr.bf16.mxu0 %v1559_v37  ;;  %v457_v36 = vld [vmem:[#allocation5 + $0xb10] sm:$0xff]  ;;  %v1771_v37 = vpack.c.bf16 %v462_v30, %v458_v29  ;;  %v1581_v43 = vpack.c.bf16 %v459_v35, %v455_v34  ;;  %v1823_v35 = vpack.c.bf16 %v1118_v27, %v1117_v26  ;;  %v1095_v26 = vld [vmem:[#allocation8 + $0xe0] sm:$0xff] }
  0xfb   :  { %1752 = vmatprep.subr.bf16.mxu1 %v1751_v41  ;;  %v466_v41 = vld [vmem:[#allocation5 + $0xb58] sm:$0xff]  ;;  %v1773_v44 = vpack.c.bf16 %v461_v38, %v457_v36  ;;  %v1088_v38 = vld [vmem:[#allocation8 + $0xa8] sm:$0xff] }
  0xfc   :  { %v1101_v34 = vld [vmem:[#allocation8 + $0x110] sm:$0xff]  ;;  %v1102_v36 = vld [vmem:[#allocation8 + $0x118] sm:$0xff]  ;;  %v1096_v27 = vld [vmem:[#allocation8 + $0xe8] sm:$0xff] }
  0xfd   :  { %1562 = vmatpush1.bf16.msra.mxu0 %v1561_v47  ;;  %v467_v47 = vld [vmem:[#allocation5 + $0xb60] sm:$0xff] }
  0xfe   :  { %1754 = vmatpush1.bf16.msra.mxu1 %v1753_v48  ;;  %1564 = vmatprep.subr.bf16.mxu0 %v1563_v49  ;;  %v465_v48 = vld [vmem:[#allocation5 + $0xb50] sm:$0xff]  ;;  %v1775_v49 = vpack.c.bf16 %v470_v42, %v466_v41  ;;  %v1585_v55 = vpack.c.bf16 %v467_v47, %v463_v46  ;;  %v102_v42 = vld [vmem:[#allocation2 + $0x88] sm:$0xf]  ;;  %v1071_v46 = vld [vmem:[#allocation8 + $0x20] sm:$0xff] }
  0xff   :  { %1756 = vmatprep.subr.bf16.mxu1 %v1755_v53  ;;  %v474_v53 = vld [vmem:[#allocation5 + $0xb98] sm:$0xff]  ;;  %v1777_v56 = vpack.c.bf16 %v469_v50, %v465_v48  ;;  %v1120_v41 = vld [vmem:[#allocation8 + $0x1a8] sm:$0xff] }
 0x100   :  { %v1072_v47 = vld [vmem:[#allocation8 + $0x28] sm:$0xff]  ;;  %v1827_v48 = vpack.c.bf16 %v1120_v41, %v1119_v40  ;;  %v1129_v40 = vld [vmem:[#allocation8 + $0x1f0] sm:$0xff] }
 0x101   :  { %1566 = vmatpush1.bf16.msra.mxu0 %v1565_v59  ;;  %v475_v59 = vld [vmem:[#allocation5 + $0xba0] sm:$0xff]  ;;  %v1104_v50 = vld [vmem:[#allocation8 + $0x128] sm:$0xff]  ;;  %v1797_v52 = vpack.c.bf16 %v1072_v47, %v1071_v46  ;;  %v1113_v47 = vld [vmem:[#allocation8 + $0x170] sm:$0xff] }
 0x102   :  { %1758 = vmatpush1.bf16.msra.mxu1 %v1757_v60  ;;  %1568 = vmatprep.subr.bf16.mxu0 %v1567_v61  ;;  %v473_v60 = vld [vmem:[#allocation5 + $0xb90] sm:$0xff]  ;;  %v1779_v61 = vpack.c.bf16 %v478_v54, %v474_v53  ;;  %v1589_v3 = vpack.c.bf16 %v475_v59, %v471_v58  ;;  %v1122_v58 = vld [vmem:[#allocation8 + $0x1b8] sm:$0xff] }
 0x103   :  { %1760 = vmatprep.subr.bf16.mxu1 %v1759_v1  ;;  %v482_v1 = vld [vmem:[#allocation5 + $0xbd8] sm:$0xff]  ;;  %v1781_v4 = vpack.c.bf16 %v477_v62, %v473_v60 }
 0x104   :  { %v1089_v54 = vld [vmem:[#allocation8 + $0xb0] sm:$0xff]  ;;  %v1074_v60 = vld [vmem:[#allocation8 + $0x38] sm:$0xff] }
 0x105   :  { %1570 = vmatpush1.bf16.msra.mxu0 %v1569_v7  ;;  %v483_v7 = vld [vmem:[#allocation5 + $0xbe0] sm:$0xff]  ;;  %v1073_v59 = vld [vmem:[#allocation8 + $0x30] sm:$0xff] }
 0x106   :  { %1762 = vmatpush1.bf16.msra.mxu1 %v1761_v8  ;;  %1572 = vmatprep.subr.bf16.mxu0 %v1571_v9  ;;  %v481_v8 = vld [vmem:[#allocation5 + $0xbd0] sm:$0xff]  ;;  %v1783_v9 = vpack.c.bf16 %v486_v2, %v482_v1  ;;  %v1593_v15 = vpack.c.bf16 %v483_v7, %v479_v6  ;;  %v1801_v62 = vpack.c.bf16 %v1074_v60, %v1073_v59  ;;  %v1091_v2 = vld [vmem:[#allocation8 + $0xc0] sm:$0xff] }
 0x107   :  { %1764 = vmatprep.subr.bf16.mxu1 %v1763_v13  ;;  %v1115_v13 = vld [vmem:[#allocation8 + $0x180] sm:$0xff]  ;;  %v1785_v16 = vpack.c.bf16 %v485_v10, %v481_v8  ;;  %v1833_v1 = vpack.c.bf16 %v1106_v0, %v1105_v63  ;;  %v1124_v6 = vld [vmem:[#allocation8 + $0x1c8] sm:$0xff] }
 0x108   :  { %v1819_v18 = vpack.c.bf16 %v1116_v14, %v1115_v13  ;;  %v1075_v7 = vld [vmem:[#allocation8 + $0x40] sm:$0xff]  ;;  %v1076_v8 = vld [vmem:[#allocation8 + $0x48] sm:$0xff]  ;;  %v1837_v13 = vpack.c.bf16 %v1108_v12, %v1107_v11  ;;  %v1093_v14 = vld [vmem:[#allocation8 + $0xd0] sm:$0xff] }
 0x109   :  { %1574 = vmatpush1.bf16.msra.mxu0 %v1573_v19  ;;  %v1067_v19 = vld [vmem:[#allocation8] sm:$0xff]  ;;  %v1805_v10 = vpack.c.bf16 %v1076_v8, %v1075_v7 }
 0x10a   :  { %1766 = vmatpush1.bf16.msra.mxu1 %v1765_v20  ;;  %1576 = vmatprep.subr.bf16.mxu0 %v1575_v21  ;;  %v1068_v20 = vld [vmem:[#allocation8 + $0x8] sm:$0xff]  ;;  %v1099_v21 = vld [vmem:[#allocation8 + $0x100] sm:$0xff] }
 0x10b   :  { %1768 = vmatprep.subr.bf16.mxu1 %v1767_v25  ;;  %v89_v25 = vld [vmem:[#allocation2 + $0x20] sm:$0xff]  ;;  %v1789_v29 = vpack.c.bf16 %v1068_v20, %v1067_v19  ;;  %v1821_v30 = vpack.c.bf16 %v1100_v22, %v1099_v21  ;;  %v1078_v20 = vld [vmem:[#allocation8 + $0x58] sm:$0xff] }
 0x10c   :  { %v1077_v19 = vld [vmem:[#allocation8 + $0x50] sm:$0xff] }
 0x10d   :  { %1578 = vmatpush1.bf16.msra.mxu0 %v1577_v31  ;;  %v1791_v31 = vpack.c.bf16 %v1086_v24, %v1085_v23  ;;  %v1809_v22 = vpack.c.bf16 %v1078_v20, %v1077_v19  ;;  %v1109_v23 = vld [vmem:[#allocation8 + $0x150] sm:$0xff]  ;;  %v1110_v24 = vld [vmem:[#allocation8 + $0x158] sm:$0xff] }
 0x10e   :  { %1770 = vmatpush1.bf16.msra.mxu1 %v1769_v32  ;;  %1580 = vmatprep.subr.bf16.mxu0 %v1579_v33  ;;  %v1069_v32 = vld [vmem:[#allocation8 + $0x10] sm:$0xff]  ;;  %v1070_v33 = vld [vmem:[#allocation8 + $0x18] sm:$0xff] }
 0x10f   :  { %1772 = vmatprep.subr.bf16.mxu1 %v1771_v37  ;;  %v1087_v37 = vld [vmem:[#allocation8 + $0xa0] sm:$0xff] }
 0x111   :  { %1582 = vmatpush1.bf16.msra.mxu0 %v1581_v43  ;;  %v1793_v43 = vpack.c.bf16 %v1070_v33, %v1069_v32  ;;  %v1080_v32 = vld [vmem:[#allocation8 + $0x68] sm:$0xff] }
 0x112   :  { %1774 = vmatpush1.bf16.msra.mxu1 %v1773_v44  ;;  %1584 = vmatprep.subr.bf16.mxu0 %v1583_v45  ;;  %v1825_v44 = vpack.c.bf16 %v1102_v36, %v1101_v34  ;;  %v1795_v45 = vpack.c.bf16 %v1088_v38, %v1087_v37  ;;  %v1112_v36 = vld [vmem:[#allocation8 + $0x168] sm:$0xff]  ;;  %v1097_v38 = vld [vmem:[#allocation8 + $0xf0] sm:$0xff] }
 0x113   :  { %1776 = vmatprep.subr.bf16.mxu1 %v1775_v49  ;;  %v1103_v49 = vld [vmem:[#allocation8 + $0x120] sm:$0xff] }
 0x114   :  { %v1829_v53 = vpack.c.bf16 %v1104_v50, %v1103_v49  ;;  %v489_v50 = vlaneseq }
 0x115   :  { %1586 = vmatpush1.bf16.msra.mxu0 %v1585_v55  ;;  %v1090_v55 = vld [vmem:[#allocation8 + $0xb8] sm:$0xff] }
 0x116   :  { %1778 = vmatpush1.bf16.msra.mxu1 %v1777_v56  ;;  %1588 = vmatprep.subr.bf16.mxu0 %v1587_v57  ;;  %v1121_v56 = vld [vmem:[#allocation8 + $0x1b0] sm:$0xff]  ;;  %v1799_v57 = vpack.c.bf16 %v1090_v55, %v1089_v54 }
 0x117   :  { %1780 = vmatprep.subr.bf16.mxu1 %v1779_v61  ;;  %v1831_v61 = vpack.c.bf16 %v1122_v58, %v1121_v56 }
 0x119   :  { %1590 = vmatpush1.bf16.msra.mxu0 %v1589_v3  ;;  %v1092_v3 = vld [vmem:[#allocation8 + $0xc8] sm:$0xff] }
 0x11a   :  { %1782 = vmatpush1.bf16.msra.mxu1 %v1781_v4  ;;  %1592 = vmatprep.subr.bf16.mxu0 %v1591_v5  ;;  %v1123_v4 = vld [vmem:[#allocation8 + $0x1c0] sm:$0xff]  ;;  %v1803_v5 = vpack.c.bf16 %v1092_v3, %v1091_v2 }
 0x11b   :  { %1784 = vmatprep.subr.bf16.mxu1 %v1783_v9  ;;  %v1835_v9 = vpack.c.bf16 %v1124_v6, %v1123_v4 }
 0x11d   :  { %1594 = vmatpush1.bf16.msra.mxu0 %v1593_v15  ;;  %v1094_v15 = vld [vmem:[#allocation8 + $0xd8] sm:$0xff] }
 0x11e   :  { %1786 = vmatpush1.bf16.msra.mxu1 %v1785_v16  ;;  %1788 = vmatprep.subr.bf16.mxu0 %v1787_v17  ;;  %v1125_v16 = vld [vmem:[#allocation8 + $0x1d0] sm:$0xff]  ;;  %v1807_v17 = vpack.c.bf16 %v1094_v15, %v1093_v14 }
 0x11f   :  { %1820 = vmatprep.subr.bf16.mxu1 %v1819_v18  ;;  %v1126_v18 = vld [vmem:[#allocation8 + $0x1d8] sm:$0xff] }
 0x120   :  { %740 = vmatmul.mubr.f32.vlgmr.msra.gmra.mrb[0].mxu0 %v89_v25  ;;  %v1839_v21 = vpack.c.bf16 %v1126_v18, %v1125_v16 }
 0x121   :  { %989 = vmatmul.mubr.f32.vlgmr.msra.gmra.mrb[0].mxu1 %v89_v25  ;;  %745 = vmatprep.mubr.f32.mxu0 %v96_v28  ;;  %v1841_v25 = vpack.c.bf16 %v1110_v24, %v1109_v23 }
 0x122   :  { %994 = vmatprep.mubr.f32.mxu1 %v96_v28  ;;  %1790 = vmatpush3.bf16.msra.mxu0 %v1789_v29  ;;  %v1127_v28 = vld [vmem:[#allocation8 + $0x1e0] sm:$0xff]  ;;  %v1811_v29 = vpack.c.bf16 %v1096_v27, %v1095_v26 }
 0x123   :  { %1822 = vmatpush3.bf16.msra.mxu1 %v1821_v30  ;;  %1792 = vmatprep.subr.bf16.mxu0 %v1791_v31  ;;  %v1128_v30 = vld [vmem:[#allocation8 + $0x1e8] sm:$0xff]  ;;  %v1079_v31 = vld [vmem:[#allocation8 + $0x60] sm:$0xff] }
 0x124   :  { %746 = vmatmul.mubr.f32.gmra.mrb[2].mxu0 %v95_v39  ;;  %1824 = vmatprep.subr.bf16.mxu1 %v1823_v35  ;;  %v1843_v33 = vpack.c.bf16 %v1128_v30, %v1127_v28  ;;  %v1813_v34 = vpack.c.bf16 %v1080_v32, %v1079_v31  ;;  %v1111_v35 = vld [vmem:[#allocation8 + $0x160] sm:$0xff] }
 0x125   :  { %995 = vmatmul.mubr.f32.gmra.mrb[2].mxu1 %v95_v39  ;;  %751 = vmatprep.mubr.f32.mxu0 %v102_v42  ;;  %v1845_v37 = vpack.c.bf16 %v1112_v36, %v1111_v35  ;;  %v1098_v39 = vld [vmem:[#allocation8 + $0xf8] sm:$0xff] }
 0x126   :  { %1000 = vmatprep.mubr.f32.mxu1 %v102_v42  ;;  %1794 = vmatpush3.bf16.msra.mxu0 %v1793_v43  ;;  %v1815_v41 = vpack.c.bf16 %v1098_v39, %v1097_v38  ;;  %v1130_v42 = vld [vmem:[#allocation8 + $0x1f8] sm:$0xff]  ;;  %v1081_v43 = vld [vmem:[#allocation8 + $0x70] sm:$0xff] }
 0x127   :  { %1826 = vmatpush3.bf16.msra.mxu1 %v1825_v44  ;;  %1796 = vmatprep.subr.bf16.mxu0 %v1795_v45  ;;  %v1082_v44 = vld [vmem:[#allocation8 + $0x78] sm:$0xff]  ;;  %v1847_v45 = vpack.c.bf16 %v1130_v42, %v1129_v40 }
 0x128   :  { %752 = vmatmul.mubr.f32.gmra.mrb[4].mxu0 %v101_v51  ;;  %1828 = vmatprep.subr.bf16.mxu1 %v1827_v48  ;;  %v1817_v46 = vpack.c.bf16 %v1082_v44, %v1081_v43  ;;  %v1114_v48 = vld [vmem:[#allocation8 + $0x178] sm:$0xff] }
 0x129   :  { %1001 = vmatmul.mubr.f32.gmra.mrb[4].mxu1 %v101_v51  ;;  %v1849_v49 = vpack.c.bf16 %v1114_v48, %v1113_v47  ;;  %v490_v51 = vshrl.u32 %v489_v50, 7 }
 0x12a   :  { %1798 = vmatpush3.bf16.msra.mxu0 %v1797_v52 }
 0x12b   :  { %1830 = vmatpush3.bf16.msra.mxu1 %v1829_v53  ;;  %1800 = vmatprep.subr.bf16.mxu0 %v1799_v57  ;;  %v491_v52 = vsub.s32 0, %v490_v51  ;;  %v487_v53 = vld [vmem:[#allocation7] sm:$0xf]  ;;  %v499_v54 = vsub.s32 2, %v490_v51  ;;  %v495_v55 = vsub.s32 1, %v490_v51  ;;  %v503_v56 = vsub.s32 3, %v490_v51 }
 0x12c   :  { %1832 = vmatprep.subr.bf16.mxu1 %v1831_v61 }
 0x12d   :  { %v492_v57 = vrot.slane %v487_v53, %v491_v52  ;;  %v500_v58 = vrot.slane %v487_v53, %v499_v54  ;;  %v496_v59 = vrot.slane %v487_v53, %v495_v55  ;;  %v504_v60 = vrot.slane %v487_v53, %v503_v56 }
 0x12e   :  { %1802 = vmatpush3.bf16.msra.mxu0 %v1801_v62 }
 0x12f   :  { %1834 = vmatpush3.bf16.msra.mxu1 %v1833_v1  ;;  %1804 = vmatprep.subr.bf16.mxu0 %v1803_v5 }
 0x130   :  { %1836 = vmatprep.subr.bf16.mxu1 %v1835_v9 }
 0x132   :  { %1806 = vmatpush3.bf16.msra.mxu0 %v1805_v10 }
 0x133   :  { %1838 = vmatpush3.bf16.msra.mxu1 %v1837_v13  ;;  %1808 = vmatprep.subr.bf16.mxu0 %v1807_v17 }
 0x134   :  { %1840 = vmatprep.subr.bf16.mxu1 %v1839_v21 }
 0x136   :  { %1810 = vmatpush3.bf16.msra.mxu0 %v1809_v22 }
 0x137   :  { %1842 = vmatpush3.bf16.msra.mxu1 %v1841_v25  ;;  %1812 = vmatprep.subr.bf16.mxu0 %v1811_v29 }
 0x138   :  { %1844 = vmatprep.subr.bf16.mxu1 %v1843_v33 }
 0x13a   :  { %1814 = vmatpush3.bf16.msra.mxu0 %v1813_v34 }
 0x13b   :  { %1846 = vmatpush3.bf16.msra.mxu1 %v1845_v37  ;;  %1816 = vmatprep.subr.bf16.mxu0 %v1815_v41 }
 0x13c   :  { %1848 = vmatprep.subr.bf16.mxu1 %v1847_v45 }
 0x13e   :  { %1818 = vmatpush3.bf16.msra.mxu0 %v1817_v46 }
 0x13f   :  { %1850 = vmatpush3.bf16.msra.mxu1 %v1849_v49 }
 0x1f3   :  { %v741_v61 = vpop.f32.mrb[0].mxu0 }
 0x1f4   :  { %v1851_v62 = vadd.f32 %v741_v61, %v492_v57  ;;  %v990_v63 = vpop.f32.mrb[0].mxu1  ;;  %v743_v0 = vpop.f32.mrb[1].mxu0 }
 0x1f5   :  { %v1857_v1 = vadd.f32 %v990_v63, %v500_v58  ;;  %v1852_v2 = vadd.f32 %v743_v0, %v496_v59  ;;  %v992_v3 = vpop.f32.mrb[1].mxu1 }
 0x1f6   :  { %v1019_v4 = vmul.f32 0.70710677, %v1851_v62  ;;  %v1858_v5 = vadd.f32 %v992_v3, %v504_v60  ;;  %v1007_v41 = vmul.f32 0.5, %v1851_v62 }
 0x1f7   :  { %v1021_v6 = vmul.f32 0.70710677, %v1857_v1  ;;  %v1020_v7 = vmul.f32 0.70710677, %v1852_v2  ;;  %v747_v9 = vpop.f32.mrb[2].mxu0  ;;  %v1008_v39 = vmul.f32 0.5, %v1852_v2 }
 0x1f8   :  { %1899 = verf.f32 %v1019_v4  ;;  %v1022_v8 = vmul.f32 0.70710677, %v1858_v5  ;;  %v996_v10 = vpop.f32.mrb[2].mxu1  ;;  %v1853_v11 = vadd.f32 %v747_v9, %v492_v57  ;;  %v749_v13 = vpop.f32.mrb[3].mxu0  ;;  %v1010_v42 = vmul.f32 0.5, %v1858_v5 }
 0x1f9   :  { %1901 = verf.f32 %v1021_v6  ;;  %v2168_v12 = vadd.f32 %v996_v10, %v500_v58  ;;  %v998_v14 = vpop.f32.mrb[3].mxu1  ;;  %v1854_v15 = vadd.f32 %v749_v13, %v496_v59  ;;  %v1009_v45 = vmul.f32 0.5, %v1857_v1 }
 0x1fa   :  { %1903 = verf.f32 %v1020_v7  ;;  %v1860_v16 = vadd.f32 %v998_v14, %v504_v60  ;;  %v1023_v17 = vmul.f32 0.70710677, %v1853_v11 }
 0x1fb   :  { %1905 = verf.f32 %v1022_v8  ;;  %v753_v18 = vpop.f32.mrb[4].mxu0  ;;  %v1025_v19 = vmul.f32 0.70710677, %v2168_v12  ;;  %v1024_v20 = vmul.f32 0.70710677, %v1854_v15  ;;  %v1012_v55 = vmul.f32 0.5, %v1854_v15 }
 0x1fc   :  { %1907 = verf.f32 %v1023_v17  ;;  %v1026_v21 = vmul.f32 0.70710677, %v1860_v16  ;;  %v2171_v22 = vadd.f32 %v753_v18, %v492_v57  ;;  %v1002_v23 = vpop.f32.mrb[4].mxu1  ;;  %v755_v24 = vpop.f32.mrb[5].mxu0  ;;  %v1013_v62 = vmul.f32 0.5, %v2168_v12 }
 0x1fd   :  { %1909 = verf.f32 %v1025_v19  ;;  %v2173_v25 = vadd.f32 %v1002_v23, %v500_v58  ;;  %v1856_v26 = vadd.f32 %v755_v24, %v496_v59  ;;  %v1004_v27 = vpop.f32.mrb[5].mxu1  ;;  %v1011_v58 = vmul.f32 0.5, %v1853_v11  ;;  %v1320_v19 = vld [vmem:[#allocation10] ss:$0 sm:$0xff] }
 0x1fe   :  { %1911 = verf.f32 %v1024_v20  ;;  %v1027_v28 = vmul.f32 0.70710677, %v2171_v22  ;;  %v1862_v29 = vadd.f32 %v1004_v27, %v504_v60  ;;  %v1014_v59 = vmul.f32 0.5, %v1860_v16 }
 0x1ff   :  { %1913 = verf.f32 %v1026_v21  ;;  %v1029_v30 = vmul.f32 0.70710677, %v2173_v25  ;;  %v1028_v31 = vmul.f32 0.70710677, %v1856_v26  ;;  %v1016_v6 = vmul.f32 0.5, %v1856_v26 }
 0x200   :  { %1915 = verf.f32 %v1027_v28  ;;  %v1030_v32 = vmul.f32 0.70710677, %v1862_v29  ;;  %v1015_v9 = vmul.f32 0.5, %v2171_v22  ;;  %v1018_v10 = vmul.f32 0.5, %v1862_v29 }
 0x201   :  { %1917 = verf.f32 %v1029_v30  ;;  %v1017_v13 = vmul.f32 0.5, %v2173_v25 }
 0x202   :  { %v1900_v33 = vpop.eup %1899  ;;  %1919 = verf.f32 %v1028_v31 }
 0x203   :  { %v1902_v34 = vpop.eup %1901  ;;  %v1043_v36 = vadd.f32 1.0, %v1900_v33  ;;  %1921 = verf.f32 %v1030_v32 }
 0x204   :  { %v1904_v35 = vpop.eup %1903  ;;  %v1045_v38 = vadd.f32 1.0, %v1902_v34 }
 0x205   :  { %v1906_v37 = vpop.eup %1905  ;;  %v1044_v40 = vadd.f32 1.0, %v1904_v35  ;;  %v1055_v48 = vmul.f32 %v1043_v36, %v1007_v41 }
 0x206   :  { %v1046_v43 = vadd.f32 1.0, %v1906_v37  ;;  %v1908_v44 = vpop.eup %1907  ;;  %v1057_v51 = vmul.f32 %v1045_v38, %v1009_v45 }
 0x207   :  { %v1056_v46 = vmul.f32 %v1044_v40, %v1008_v39  ;;  %v1910_v47 = vpop.eup %1909  ;;  %v1047_v52 = vadd.f32 1.0, %v1908_v44 }
 0x208   :  { %v1058_v49 = vmul.f32 %v1046_v43, %v1010_v42  ;;  %v1912_v50 = vpop.eup %1911  ;;  %v1049_v54 = vadd.f32 1.0, %v1910_v47 }
 0x209   :  { %1202 = vmatprep.mubr.f32.mxu0 %v1056_v46  ;;  %v1914_v53 = vpop.eup %1913  ;;  %v1048_v56 = vadd.f32 1.0, %v1912_v50  ;;  %v1059_v3 = vmul.f32 %v1047_v52, %v1011_v58 }
 0x20a   :  { %1282 = vmatprep.mubr.f32.mxu1 %v1058_v49  ;;  %1203 = vmatmul.mubr.f32.vlgmr.msra.gmra.mrb[6].mxu0 %v1055_v48  ;;  %v1916_v57 = vpop.eup %1915  ;;  %v1050_v60 = vadd.f32 1.0, %v1914_v53  ;;  %v1061_v8 = vmul.f32 %v1049_v54, %v1013_v62 }
 0x20b   :  { %1283 = vmatmul.mubr.f32.vlgmr.msra.gmra.mrb[6].mxu1 %v1057_v51  ;;  %v1918_v61 = vpop.eup %1917  ;;  %v1060_v63 = vmul.f32 %v1048_v56, %v1012_v55  ;;  %v1051_v1 = vadd.f32 1.0, %v1916_v57 }
 0x20c   :  { %v1920_v0 = vpop.eup %1919  ;;  %v1062_v2 = vmul.f32 %v1050_v60, %v1014_v59  ;;  %v1053_v5 = vadd.f32 1.0, %v1918_v61 }
 0x20d   :  { %v1922_v4 = vpop.eup %1921  ;;  %v1052_v7 = vadd.f32 1.0, %v1920_v0  ;;  %1207 = vmatprep.mubr.f32.mxu0 %v1060_v63  ;;  %v1063_v15 = vmul.f32 %v1051_v1, %v1015_v9 }
 0x20e   :  { %v1054_v11 = vadd.f32 1.0, %v1922_v4  ;;  %1287 = vmatprep.mubr.f32.mxu1 %v1062_v2  ;;  %1208 = vmatmul.mubr.f32.gmra.mrb[8].mxu0 %v1059_v3  ;;  %v1065_v16 = vmul.f32 %v1053_v5, %v1017_v13 }
 0x20f   :  { %1288 = vmatmul.mubr.f32.gmra.mrb[8].mxu1 %v1061_v8  ;;  %v1064_v12 = vmul.f32 %v1052_v7, %v1016_v6 }
 0x210   :  { %v1066_v14 = vmul.f32 %v1054_v11, %v1018_v10 }
 0x211   :  { %1212 = vmatprep.mubr.f32.mxu0 %v1064_v12 }
 0x212   :  { %1292 = vmatprep.mubr.f32.mxu1 %v1066_v14  ;;  %1213 = vmatmul.mubr.f32.gmra.mrb[10].mxu0 %v1063_v15 }
 0x213   :  { %1293 = vmatmul.mubr.f32.gmra.mrb[10].mxu1 %v1065_v16 }
 0x2dd   :  { %v1353_v17 = vpop.f32.mrb[6].mxu0 }
 0x2de   :  { %v1394_v18 = vpop.f32.mrb[6].mxu1  ;;  %v1354_v20 = vpop.f32.mrb[7].mxu0 }
 0x2df   :  { %v1355_v21 = vadd.f32 %v1354_v20, %v1353_v17  ;;  %v1395_v22 = vpop.f32.mrb[7].mxu1 }
 0x2e0   :  { %v1396_v23 = vadd.f32 %v1395_v22, %v1394_v18 }
 0x2e1   :  { %v1205_v24 = vadd.f32 %v1355_v21, %v1320_v19  ;;  %v1356_v26 = vpop.f32.mrb[8].mxu0 }
 0x2e2   :  { %v1397_v25 = vpop.f32.mrb[8].mxu1  ;;  %v1357_v28 = vpop.f32.mrb[9].mxu0 }
 0x2e3   :  { %v1285_v27 = vadd.f32 %v1396_v23, %v1205_v24  ;;  %v1358_v29 = vadd.f32 %v1357_v28, %v1356_v26  ;;  %v1398_v30 = vpop.f32.mrb[9].mxu1 }
 0x2e4   :  { %v1399_v31 = vadd.f32 %v1398_v30, %v1397_v25 }
 0x2e5   :  { %1298 = vst [vmem:[#allocation11] sm:$0xff] %v1285_v27  ;;  %v1210_v32 = vadd.f32 %v1358_v29, %v1320_v19  ;;  %v1359_v33 = vpop.f32.mrb[10].mxu0 }
 0x2e6   :  { %v1400_v34 = vpop.f32.mrb[10].mxu1  ;;  %v1360_v35 = vpop.f32.mrb[11].mxu0 }
 0x2e7   :  { %v1290_v36 = vadd.f32 %v1399_v31, %v1210_v32  ;;  %v1361_v37 = vadd.f32 %v1360_v35, %v1359_v33  ;;  %v1401_v38 = vpop.f32.mrb[11].mxu1 }
 0x2e8   :  { %v1402_v39 = vadd.f32 %v1401_v38, %v1400_v34 }
 0x2e9   :  { %1299 = vst [vmem:[#allocation11 + $0x8] sm:$0xff] %v1290_v36  ;;  %v1215_v40 = vadd.f32 %v1361_v37, %v1320_v19 }
 0x2eb   :  { %v1295_v41 = vadd.f32 %v1402_v39, %v1215_v40 }
 0x2ed   :  { %1300 = vst [vmem:[#allocation11 + $0x10] sm:$0xf] %v1295_v41 }
 0x2ee   :  { %2044 = shalt.err (!%p2041_p2)
}
 0x2ef   :  { %s2045_s10 = scalar_lea.hbm %s2200_s5, 384 }
 0x2f0   :  { %p2046_p3 = scmp.ne.s32.totalorder %s2200_s5, %s2045_s10  ;;  %p2049_p4 = scmp.lt.u32.totalorder %s2045_s10, %s2200_s5 }
 0x2f2   :  { %p2051_p5 = pnand %p2049_p4, %p2046_p3 }
 0x2f4   :  { %2054 = shalt.err (!%p2051_p5)
}
 0x2f5   :  { %1312 = dma.vmem_to_hbm [thread:$0]  %s1307_s6, 384, %s2200_s5, [#allocation4], %s2067_s1, %s2067_s1, %s2068_s17  }
 0x2f6   :  { %2061 = dma.done.wait [#allocation4], 384  }
 0x2f7   :  { %2062 = vsyncadd [#allocation4], 4294966912 }
 0x2f8   :  { %1316 = vsyncpa [#allocation3], 1 }
 0x2f9   :  { %1317 = vsyncpa [#allocation6], 1 }
 0x2fa   :  { %1318 = vsyncpa [#allocation9], 1 }
 0x2fb   :  { %1319 = vsyncpa [#allocation4], 1 }

</bundles_post_ra>
